<compile_context>
chip_gen: v6e
topology: v6e:2x2x1
jax: 0.10.0
libtpu: 0.0.40
codegen_flags: <defaults>
</compile_context>

<pallas_src>
import functools
import math

import numpy as np
import jax
import jax.numpy as jnp
from jax import lax
from jax.experimental import pallas as pl
from jax.experimental.pallas import tpu as pltpu

_LANES = 128                      # lane width (last axis of every block)
_TS_MAX = 512                     # max sublane rows per block (512*128*4B = 256 KiB/channel)
_VMEM_LIMIT = 32 * 1024 * 1024    # explicit scoped-VMEM limit, safe on v5e/v6e/v7x


# ----------------------------------------------------------------------------- math helpers
def _atan_approx(x, rcp):
    """Cephes-style float32 arctan using add/mul/select + the supplied reciprocal."""
    sign = jnp.where(x < 0.0, -1.0, 1.0)
    a = jnp.abs(x)
    tan3pi8 = 2.414213562373095
    tanpi8 = 0.4142135623730950
    big = a > tan3pi8
    mid = jnp.logical_and(a > tanpi8, jnp.logical_not(big))
    y0 = jnp.where(big, math.pi / 2.0, jnp.where(mid, math.pi / 4.0, 0.0))
    xr = jnp.where(big, -rcp(a + 1e-30), jnp.where(mid, (a - 1.0) * rcp(a + 1.0), a))
    z = xr * xr
    p = ((8.05374449538e-2 * z - 1.38776856032e-1) * z + 1.99777106478e-1) * z \
        - 3.33329491539e-1
    return sign * (y0 + xr + xr * z * p)


def _focal_per_element(logit_channels, tcls_f, alpha, gamma):
    """Cross-entropy + focal weighting, unrolled over the (small) class dim."""
    mx = logit_channels[0]
    for l in logit_channels[1:]:
        mx = jnp.maximum(mx, l)
    sexp = jnp.zeros_like(mx)
    for l in logit_channels:
        sexp = sexp + jnp.exp(l - mx)
    lse = mx + jnp.log(sexp)
    tgt = jnp.zeros_like(mx)
    for c, l in enumerate(logit_channels):
        tgt = jnp.where(tcls_f == float(c), l, tgt)
    ce = lse - tgt
    pt = jnp.exp(-ce)
    if gamma == 2.0:
        w = (1.0 - pt) * (1.0 - pt)
    else:
        w = jnp.maximum(1.0 - pt, 1e-12) ** gamma
    return alpha * w * ce


def _ciou_loss_per_element(px, py, pw, ph, tx, ty, tw, th, *, atan_fn, rcp):
    """Complete-IoU loss per element; `rcp` supplies the reciprocal implementation."""
    p_x1, p_y1 = px - pw * 0.5, py - ph * 0.5
    p_x2, p_y2 = px + pw * 0.5, py + ph * 0.5
    t_x1, t_y1 = tx - tw * 0.5, ty - th * 0.5
    t_x2, t_y2 = tx + tw * 0.5, ty + th * 0.5
    ix1 = jnp.maximum(p_x1, t_x1)
    iy1 = jnp.maximum(p_y1, t_y1)
    ix2 = jnp.minimum(p_x2, t_x2)
    iy2 = jnp.minimum(p_y2, t_y2)
    inter = jnp.maximum(ix2 - ix1, 0.0) * jnp.maximum(iy2 - iy1, 0.0)
    union = pw * ph + tw * th - inter
    iou = inter * rcp(union + 1e-8)
    ex1 = jnp.minimum(p_x1, t_x1)
    ey1 = jnp.minimum(p_y1, t_y1)
    ex2 = jnp.maximum(p_x2, t_x2)
    ey2 = jnp.maximum(p_y2, t_y2)
    ew, eh = ex2 - ex1, ey2 - ey1
    center_d = (px - tx) * (px - tx) + (py - ty) * (py - ty)
    diag = ew * ew + eh * eh
    d_atan = atan_fn(tw * rcp(th + 1e-8)) - atan_fn(pw * rcp(ph + 1e-8))
    v = (4.0 / (math.pi ** 2)) * d_atan * d_atan
    alpha_c = v * rcp(1.0 - iou + v + 1e-8)
    ciou = iou - center_d * rcp(diag + 1e-8) - alpha_c * v
    return 1.0 - ciou


def _bce_with_logits_per_element(x, z):
    """Numerically-stable BCE-with-logits (matches torch's formula)."""
    return jnp.maximum(x, 0.0) - x * z + jnp.log(1.0 + jnp.exp(-jnp.abs(x)))


# ----------------------------------------------------------------------------- hardware query
@functools.lru_cache(maxsize=1)
def _num_tensorcores():
    """Best-effort TensorCore count for the megacore 'parallel' split (default 1)."""
    try:
        info = pltpu.get_tpu_info()
        for attr in ("num_cores", "num_tensorcores", "tensorcore_count",
                     "cores_per_chip"):
            v = getattr(info, attr, None)
            if isinstance(v, int) and v > 0:
                return v
    except Exception:
        pass
    try:
        kind = jax.devices()[0].device_kind.lower()
        if any(t in kind for t in ("v4", "v5p", "v7")):
            return 2
    except Exception:
        pass
    return 1


# ----------------------------------------------------------------------------- dense BCE kernel
def _make_bce_kernel(*, ts, num_par, num_blocks, n_valid):
    def kernel(obj_ref, tobj_ref, out_ref):
        p = pl.program_id(0)                 # megacore slice ('parallel')
        i = pl.program_id(1)                 # reduction step ('arbitrary')
        gb = i * num_par + p                 # interleaved global block id (load balance)

        @pl.when(i == 0)
        def _init():
            out_ref[...] = jnp.zeros_like(out_ref)

        bce = _bce_with_logits_per_element(obj_ref[...], tobj_ref[...])
        is_tail = gb == (num_blocks - 1)

        @pl.when(jnp.logical_not(is_tail))
        def _full_block():                   # no padding possible here -> unmasked
            out_ref[0] = out_ref[0] + bce

        @pl.when(is_tail)
        def _tail_block():                   # mask the zero-padded tail positions
            row = lax.broadcasted_iota(jnp.int32, (ts, _LANES), 0)
            lane = lax.broadcasted_iota(jnp.int32, (ts, _LANES), 1)
            flat_idx = (gb * ts + row) * _LANES + lane
            valid_f = (flat_idx < n_valid).astype(jnp.float32)
            out_ref[0] = out_ref[0] + valid_f * bce

    return kernel


def _bce_sum_pallas(obj_flat, tobj_flat, *, max_tile_rows=_TS_MAX):
    """Sum of BCE-with-logits over all N positions (grid-pipelined, big tiles)."""
    N = int(obj_flat.shape[0])
    rows = -(-N // _LANES)
    ts_cap = max(8, (int(max_tile_rows) // 8) * 8)
    ts = min(ts_cap, max(8, -(-rows // 8) * 8))          # largest useful tile height
    r_pad = -(-rows // ts) * ts
    pad = r_pad * _LANES - N
    obj2 = jnp.pad(obj_flat, (0, pad)).reshape(r_pad, _LANES)
    tobj2 = jnp.pad(tobj_flat, (0, pad)).reshape(r_pad, _LANES)

    num_blocks = r_pad // ts
    cores = _num_tensorcores()
    num_par = 2 if (cores >= 2 and num_blocks >= 2 and num_blocks % 2 == 0) else 1
    inner = num_blocks // num_par

    kernel = _make_bce_kernel(ts=ts, num_par=num_par, num_blocks=num_blocks, n_valid=N)
    out = pl.pallas_call(
        kernel,
        out_shape=jax.ShapeDtypeStruct((num_par, ts, _LANES), jnp.float32),
        grid=(num_par, inner),
        in_specs=[
            pl.BlockSpec((ts, _LANES), lambda p, i: (i * num_par + p, 0)),
            pl.BlockSpec((ts, _LANES), lambda p, i: (i * num_par + p, 0)),
        ],
        out_specs=pl.BlockSpec((1, ts, _LANES), lambda p, i: (p, 0, 0)),
        compiler_params=pltpu.CompilerParams(
            dimension_semantics=("parallel", "arbitrary"),
            vmem_limit_bytes=_VMEM_LIMIT),
    )(obj2, tobj2)
    return jnp.sum(out)


# ----------------------------------------------------------------------------- sparse positive kernel
def _make_pos_kernel(*, num_classes, alpha, gamma):
    def kernel(cls_ref, pbox_ref, tbox_ref, tcls_ref, valid_ref, out_ref):
        rcp = lambda v: pl.reciprocal(v, approx=True)     # EUP vrcp, off the VALU path
        atan_fn = lambda v: _atan_approx(v, rcp=rcp)
        tcls = tcls_ref[...]
        valid = valid_ref[...]
        logit_channels = [cls_ref[c] for c in range(num_classes)]
        focal = _focal_per_element(logit_channels, tcls, alpha, gamma)
        ciou_l = _ciou_loss_per_element(
            pbox_ref[0], pbox_ref[1], pbox_ref[2], pbox_ref[3],
            tbox_ref[0], tbox_ref[1], tbox_ref[2], tbox_ref[3],
            atan_fn=atan_fn, rcp=rcp)
        out_ref[0] = valid * focal
        out_ref[1] = valid * ciou_l

    return kernel


def _positive_losses_pallas(gathered_levels, *, num_classes, alpha, gamma):
    """One small Pallas call over the compacted positives of ALL pyramid levels."""
    caps = [int(g[0].shape[0]) for g in gathered_levels]
    logits = jnp.concatenate([g[0] for g in gathered_levels], axis=0)   # (P, C)
    pbox = jnp.concatenate([g[1] for g in gathered_levels], axis=0)     # (P, 4)
    tbox = jnp.concatenate([g[2] for g in gathered_levels], axis=0)     # (P, 4)
    tcls = jnp.concatenate([g[3] for g in gathered_levels], axis=0)     # (P,)
    valid = jnp.concatenate([g[4] for g in gathered_levels], axis=0)    # (P,)
    P = int(logits.shape[0])
    rows = -(-P // _LANES)
    rows = max(8, -(-rows // 8) * 8)
    p_pad = rows * _LANES

    def _to_tiles(a):
        a = jnp.pad(a, ((0, p_pad - P),) + ((0, 0),) * (a.ndim - 1))
        if a.ndim == 1:
            return a.reshape(rows, _LANES)
        return a.T.reshape(a.shape[1], rows, _LANES)

    out = pl.pallas_call(
        _make_pos_kernel(num_classes=num_classes, alpha=alpha, gamma=gamma),
        out_shape=jax.ShapeDtypeStruct((2, rows, _LANES), jnp.float32),
        grid=(1,),
        in_specs=[
            pl.BlockSpec((num_classes, rows, _LANES), lambda i: (0, 0, 0)),
            pl.BlockSpec((4, rows, _LANES), lambda i: (0, 0, 0)),
            pl.BlockSpec((4, rows, _LANES), lambda i: (0, 0, 0)),
            pl.BlockSpec((rows, _LANES), lambda i: (0, 0)),
            pl.BlockSpec((rows, _LANES), lambda i: (0, 0)),
        ],
        out_specs=pl.BlockSpec((2, rows, _LANES), lambda i: (0, 0, 0)),
        compiler_params=pltpu.CompilerParams(vmem_limit_bytes=_VMEM_LIMIT),
    )(_to_tiles(logits), _to_tiles(pbox), _to_tiles(tbox),
      _to_tiles(tcls), _to_tiles(valid))

    out_flat = out.reshape(2, p_pad)
    focal_sums, ciou_sums = [], []
    off = 0
    for c in caps:
        focal_sums.append(jnp.sum(out_flat[0, off:off + c]))
        ciou_sums.append(jnp.sum(out_flat[1, off:off + c]))
        off += c
    return focal_sums, ciou_sums


# ----------------------------------------------------------------------------- XLA glue
def _assign_targets(targets, grid_h, grid_w, num_anchors):
    """Vectorized port of FastDetectionLoss.assign_targets (scatter per object).
    NOTE: duplicate-cell scatters follow XLA's in-order update application, which
    matches the reference's sequential last-write-wins in practice."""
    B, M, _ = targets.shape
    cls_id = targets[..., 0]
    x, y = targets[..., 1], targets[..., 2]
    w, h = targets[..., 3], targets[..., 4]
    valid = cls_id >= 0.0
    gx = jnp.clip(x * grid_w, 0.0, grid_w - 1).astype(jnp.int32)
    gy = jnp.clip(y * grid_h, 0.0, grid_h - 1).astype(jnp.int32)
    gy = jnp.where(valid, gy, grid_h)          # OOB row for invalid objects -> dropped
    b_idx = jnp.broadcast_to(jnp.arange(B, dtype=jnp.int32)[:, None], (B, M))
    b_f, gy_f, gx_f = b_idx.reshape(-1), gy.reshape(-1), gx.reshape(-1)

    cls_cell = jnp.zeros((B, grid_h, grid_w), jnp.float32).at[b_f, gy_f, gx_f].set(
        cls_id.reshape(-1), mode="drop")
    obj_cell = jnp.zeros((B, grid_h, grid_w), jnp.float32).at[b_f, gy_f, gx_f].set(
        jnp.ones((B * M,), jnp.float32), mode="drop")
    box = jnp.stack([x, y, w, h], axis=-1).reshape(B * M, 4)
    reg_cell = jnp.zeros((B, grid_h, grid_w, 4), jnp.float32).at[b_f, gy_f, gx_f].set(
        box, mode="drop")

    t_cls = jnp.broadcast_to(cls_cell[..., None], (B, grid_h, grid_w, num_anchors))
    t_obj = jnp.broadcast_to(obj_cell[..., None], (B, grid_h, grid_w, num_anchors))
    t_reg = jnp.broadcast_to(reg_cell[:, :, :, None, :],
                             (B, grid_h, grid_w, num_anchors, 4))
    return t_cls, t_reg, t_obj


def _gather_positives(cls_pred, reg_pred, t_cls, t_reg, tobj_flat, *,
                      num_classes, max_objects):
    """Compact the (sparse) positive positions with a fixed capacity B*M*A."""
    B, _, H, W = cls_pred.shape
    A = t_cls.shape[3]
    N = B * H * W * A
    p_cap = B * max_objects * A

    pos = tobj_flat > 0.0                         # (N,), (B,H,W,A) flat order
    cum = jnp.cumsum(pos.astype(jnp.int32))
    n_pos = cum[-1]
    slot = jnp.where(pos, cum - 1, p_cap)         # p_cap == OOB sentinel -> dropped
    gidx = jnp.zeros((p_cap,), jnp.int32).at[slot].set(
        jnp.arange(N, dtype=jnp.int32), mode="drop")
    gvalid = jnp.zeros((p_cap,), jnp.float32).at[slot].set(
        jnp.ones((N,), jnp.float32), mode="drop")

    # Decompose the (B,H,W,A)-order flat index; since H == W == A the same flat
    # index addresses the (B,A,H,W)-ordered predictions as (b, d1, :, d2, d3),
    # reproducing the reference's mask/prediction index-for-index pairing.
    b_i = gidx // (H * W * A)
    rem = gidx % (H * W * A)
    d1 = rem // (W * A)
    rem2 = rem % (W * A)
    d2 = rem2 // A
    d3 = rem2 % A
    cls_r = cls_pred.reshape(B, A, num_classes, H, W)
    reg_r = reg_pred.reshape(B, A, 4, H, W)
    pos_logits = cls_r[b_i, d1, :, d2, d3]        # (p_cap, C)
    pos_pbox = reg_r[b_i, d1, :, d2, d3]          # (p_cap, 4)
    pos_tcls = t_cls.reshape(N)[gidx]             # (p_cap,)
    pos_tbox = t_reg.reshape(N, 4)[gidx]          # (p_cap, 4)
    return pos_logits, pos_pbox, pos_tbox, pos_tcls, gvalid, n_pos


def _level_sums_ref(cls_pred, reg_pred, obj_pred, t_cls, t_reg, t_obj, *,
                    num_classes, alpha, gamma):
    """Pure-JAX reference (exact divides + jnp.arctan) for validating the kernels."""
    B, _, H, W = cls_pred.shape
    A = obj_pred.shape[1]
    N = B * A * H * W
    cls_flat = cls_pred.reshape(B, A, num_classes, H, W) \
                       .transpose(2, 0, 1, 3, 4).reshape(num_classes, N)
    reg_flat = reg_pred.reshape(B, A, 4, H, W) \
                       .transpose(2, 0, 1, 3, 4).reshape(4, N)
    obj_flat = obj_pred.transpose(0, 2, 3, 1).reshape(N)
    tcls_flat = t_cls.reshape(N)
    treg_flat = t_reg.reshape(N, 4).T
    tobj_flat = t_obj.reshape(N)
    pos = tobj_flat > 0.0
    exact_rcp = lambda v: 1.0 / v
    focal = jnp.where(pos, _focal_per_element(
        [cls_flat[c] for c in range(num_classes)], tcls_flat, alpha, gamma), 0.0)
    ciou_l = jnp.where(pos, _ciou_loss_per_element(
        reg_flat[0], reg_flat[1], reg_flat[2], reg_flat[3],
        treg_flat[0], treg_flat[1], treg_flat[2], treg_flat[3],
        atan_fn=jnp.arctan, rcp=exact_rcp), 0.0)
    bce = _bce_with_logits_per_element(obj_flat, tobj_flat)
    return (jnp.sum(focal), jnp.sum(ciou_l), jnp.sum(bce),
            jnp.sum(pos.astype(jnp.float32)))


# ----------------------------------------------------------------------------- forward pass
def fast_detection_loss(predictions, targets, *, num_classes=8, alpha=0.25, gamma=2.0,
                        lambda_coord=5.0, lambda_obj=1.0, lambda_noobj=0.5,
                        anchor_free=True, use_pallas=True, max_tile_rows=_TS_MAX):
    del lambda_noobj  # present in the reference module but unused by its forward
    num_levels = len(predictions['classification'])
    B, M, _ = targets.shape

    per_level = []            # [focal_sum, ciou_sum, bce_sum, n_pos(float), N]
    gathered_levels = []
    for l in range(num_levels):
        cls_pred = predictions['classification'][l]
        reg_pred = predictions['regression'][l]
        obj_pred = predictions['objectness'][l]
        _, _, H, W = cls_pred.shape
        A = obj_pred.shape[1]
        N = B * A * H * W
        t_cls, t_reg, t_obj = _assign_targets(targets, H, W, A)

        if not use_pallas:
            f_s, c_s, b_s, n_pos = _level_sums_ref(
                cls_pred, reg_pred, obj_pred, t_cls, t_reg, t_obj,
                num_classes=num_classes, alpha=alpha, gamma=gamma)
            per_level.append([f_s, c_s, b_s, n_pos, N])
            continue

        # dense objectness BCE over every position (Pallas kernel #1)
        obj_flat = obj_pred.transpose(0, 2, 3, 1).reshape(N)     # (B,H,W,A) order
        tobj_flat = t_obj.reshape(N)
        bce_sum = _bce_sum_pallas(obj_flat, tobj_flat, max_tile_rows=max_tile_rows)

        # compact the sparse positives for the focal / CIoU terms
        g = _gather_positives(cls_pred, reg_pred, t_cls, t_reg, tobj_flat,
                              num_classes=num_classes, max_objects=M)
        gathered_levels.append(g)
        per_level.append([None, None, bce_sum, g[-1].astype(jnp.float32), N])

    if use_pallas:
        focal_sums, ciou_sums = _positive_losses_pallas(
            gathered_levels, num_classes=num_classes, alpha=alpha, gamma=gamma)
        for l in range(num_levels):
            per_level[l][0] = focal_sums[l]
            per_level[l][1] = ciou_sums[l]

    tot_cls = jnp.float32(0.0)
    tot_reg = jnp.float32(0.0)
    tot_obj = jnp.float32(0.0)
    for f_s, c_s, b_s, n_pos, N in per_level:
        cls_loss = jnp.where(n_pos > 0, f_s / jnp.maximum(n_pos, 1.0), 0.0)
        reg_loss = jnp.where(n_pos > 0, c_s / (n_pos + 1e-8), 0.0)
        obj_loss = b_s / N
        tot_cls = tot_cls + cls_loss
        tot_reg = tot_reg + reg_loss
        tot_obj = tot_obj + obj_loss
    tot_cls = tot_cls / num_levels
    tot_reg = tot_reg / num_levels
    tot_obj = tot_obj / num_levels
    total = tot_cls + lambda_coord * tot_reg + lambda_obj * tot_obj
    losses = {'total_loss': total, 'cls_loss': tot_cls,
              'reg_loss': tot_reg, 'obj_loss': tot_obj}
    if anchor_free:
        # TODO(synk): the reference only adds center/scale terms when a 'center'
        # head is supplied (and its scale-loss masking is shape-ill-defined), so
        # these terms are exactly 0.0 here, matching the reference forward.
        center_loss = jnp.float32(0.0)
        scale_loss = jnp.float32(0.0)
        losses['center_loss'] = center_loss
        losses['scale_loss'] = scale_loss
        losses['total_loss'] = losses['total_loss'] + 0.5 * center_loss + 0.5 * scale_loss
    return losses


# ----------------------------------------------------------------------------- main
if __name__ == "__main__":
    key = jax.random.PRNGKey(0)
    B, num_classes = 2, 8
    # per level: H = W = num_anchors (required by the reference module's mask indexing)
    level_sizes = (20, 10)

    preds = {'classification': [], 'regression': [], 'objectness': []}
    for S in level_sizes:
        key, k1, k2, k3 = jax.random.split(key, 4)
        A = S
        preds['classification'].append(
            jax.random.normal(k1, (B, A * num_classes, S, S), jnp.float32))
        preds['regression'].append(
            0.5 * jax.random.normal(k2, (B, A * 4, S, S), jnp.float32) + 0.25)
        preds['objectness'].append(
            jax.random.normal(k3, (B, A, S, S), jnp.float32))

    # targets: [B, max_objects, 5] = (class, x, y, w, h); class < 0 marks padding
    targets = jnp.array(
        [[[1.0, 0.25, 0.25, 0.20, 0.30],
          [3.0, 0.70, 0.60, 0.10, 0.15],
          [-1.0, 0.0, 0.0, 0.0, 0.0],
          [5.0, 0.90, 0.10, 0.05, 0.08]],
         [[0.0, 0.50, 0.50, 0.40, 0.40],
          [7.0, 0.15, 0.30, 0.20, 0.10],
          [-1.0, 0.0, 0.0, 0.0, 0.0],
          [-1.0, 0.0, 0.0, 0.0, 0.0]]], jnp.float32)

    keys_to_check = ("total_loss", "cls_loss", "reg_loss", "obj_loss")

    loss_fn = jax.jit(functools.partial(fast_detection_loss, use_pallas=True))
    losses = {k: jax.block_until_ready(v) for k, v in loss_fn(preds, targets).items()}
    for k in keys_to_check:
        assert np.isfinite(np.asarray(losses[k])).all(), (k, losses[k])

    # pure-JAX reference check (loose tolerance: the kernel uses approximate
    # reciprocals and a polynomial arctan inside the CIoU term)
    ref_fn = jax.jit(functools.partial(fast_detection_loss, use_pallas=False))
    ref = {k: jax.block_until_ready(v) for k, v in ref_fn(preds, targets).items()}
    for k in keys_to_check:
        got, want = np.asarray(losses[k]), np.asarray(ref[k])
        assert np.allclose(got, want, rtol=5e-3, atol=5e-3), (k, got, want)

    # multi-block cross-check: tiny tiles force many grid steps, exercising the
    # init / accumulate / tail-mask gating / interleaved-block paths of the kernel
    small_fn = jax.jit(functools.partial(fast_detection_loss, use_pallas=True,
                                         max_tile_rows=8))
    small = {k: jax.block_until_ready(v) for k, v in small_fn(preds, targets).items()}
    for k in keys_to_check:
        got, want = np.asarray(small[k]), np.asarray(losses[k])
        assert np.allclose(got, want, rtol=1e-5, atol=1e-5), (k, got, want)

    print("KERNEL_OK")
</pallas_src>

<mosaic_0001>
module attributes {stable_mosaic.version = 11 : i64} {
  func.func @kernel(%arg0: i32, %arg1: memref<8x8x128xf32, #tpu.memory_space<vmem>>, %arg2: memref<4x8x128xf32, #tpu.memory_space<vmem>>, %arg3: memref<4x8x128xf32, #tpu.memory_space<vmem>>, %arg4: memref<8x128xf32, #tpu.memory_space<vmem>>, %arg5: memref<8x128xf32, #tpu.memory_space<vmem>>, %arg6: memref<2x8x128xf32, #tpu.memory_space<vmem>>) attributes {dimension_semantics = [#tpu.dimension_semantics<arbitrary>], iteration_bounds = array<i64: 1>, scalar_prefetch = 0 : i64, scratch_operands = 0 : i64, tpu.core_type = #tpu.core_type<tc>, window_params = [{pipeline_mode = #tpu.pipeline_mode<synchronous>, transform_indices = @transform_0, window_bounds = array<i64: 8, 8, 128>}, {pipeline_mode = #tpu.pipeline_mode<synchronous>, transform_indices = @transform_1, window_bounds = array<i64: 4, 8, 128>}, {pipeline_mode = #tpu.pipeline_mode<synchronous>, transform_indices = @transform_2, window_bounds = array<i64: 4, 8, 128>}, {pipeline_mode = #tpu.pipeline_mode<synchronous>, transform_indices = @transform_3, window_bounds = array<i64: 8, 128>}, {pipeline_mode = #tpu.pipeline_mode<synchronous>, transform_indices = @transform_4, window_bounds = array<i64: 8, 128>}, {pipeline_mode = #tpu.pipeline_mode<synchronous>, transform_indices = @transform_5, window_bounds = array<i64: 2, 8, 128>}]} {
    %c0 = arith.constant 0 : index
    %c0_0 = arith.constant 0 : index
    %0 = vector.load %arg4[%c0, %c0_0] : memref<8x128xf32, #tpu.memory_space<vmem>>, vector<8x128xf32>
    %c0_1 = arith.constant 0 : index
    %c0_2 = arith.constant 0 : index
    %1 = vector.load %arg5[%c0_1, %c0_2] : memref<8x128xf32, #tpu.memory_space<vmem>>, vector<8x128xf32>
    %c0_3 = arith.constant 0 : index
    %c0_4 = arith.constant 0 : index
    %c0_5 = arith.constant 0 : index
    %2 = vector.load %arg1[%c0_3, %c0_4, %c0_5] : memref<8x8x128xf32, #tpu.memory_space<vmem>>, vector<1x8x128xf32>
    %3 = vector.shape_cast %2 : vector<1x8x128xf32> to vector<8x128xf32>
    %c1 = arith.constant 1 : index
    %c0_6 = arith.constant 0 : index
    %c0_7 = arith.constant 0 : index
    %4 = vector.load %arg1[%c1, %c0_6, %c0_7] : memref<8x8x128xf32, #tpu.memory_space<vmem>>, vector<1x8x128xf32>
    %5 = vector.shape_cast %4 : vector<1x8x128xf32> to vector<8x128xf32>
    %c2 = arith.constant 2 : index
    %c0_8 = arith.constant 0 : index
    %c0_9 = arith.constant 0 : index
    %6 = vector.load %arg1[%c2, %c0_8, %c0_9] : memref<8x8x128xf32, #tpu.memory_space<vmem>>, vector<1x8x128xf32>
    %7 = vector.shape_cast %6 : vector<1x8x128xf32> to vector<8x128xf32>
    %c3 = arith.constant 3 : index
    %c0_10 = arith.constant 0 : index
    %c0_11 = arith.constant 0 : index
    %8 = vector.load %arg1[%c3, %c0_10, %c0_11] : memref<8x8x128xf32, #tpu.memory_space<vmem>>, vector<1x8x128xf32>
    %9 = vector.shape_cast %8 : vector<1x8x128xf32> to vector<8x128xf32>
    %c4 = arith.constant 4 : index
    %c0_12 = arith.constant 0 : index
    %c0_13 = arith.constant 0 : index
    %10 = vector.load %arg1[%c4, %c0_12, %c0_13] : memref<8x8x128xf32, #tpu.memory_space<vmem>>, vector<1x8x128xf32>
    %11 = vector.shape_cast %10 : vector<1x8x128xf32> to vector<8x128xf32>
    %c5 = arith.constant 5 : index
    %c0_14 = arith.constant 0 : index
    %c0_15 = arith.constant 0 : index
    %12 = vector.load %arg1[%c5, %c0_14, %c0_15] : memref<8x8x128xf32, #tpu.memory_space<vmem>>, vector<1x8x128xf32>
    %13 = vector.shape_cast %12 : vector<1x8x128xf32> to vector<8x128xf32>
    %c6 = arith.constant 6 : index
    %c0_16 = arith.constant 0 : index
    %c0_17 = arith.constant 0 : index
    %14 = vector.load %arg1[%c6, %c0_16, %c0_17] : memref<8x8x128xf32, #tpu.memory_space<vmem>>, vector<1x8x128xf32>
    %15 = vector.shape_cast %14 : vector<1x8x128xf32> to vector<8x128xf32>
    %c7 = arith.constant 7 : index
    %c0_18 = arith.constant 0 : index
    %c0_19 = arith.constant 0 : index
    %16 = vector.load %arg1[%c7, %c0_18, %c0_19] : memref<8x8x128xf32, #tpu.memory_space<vmem>>, vector<1x8x128xf32>
    %17 = vector.shape_cast %16 : vector<1x8x128xf32> to vector<8x128xf32>
    %18 = arith.maximumf %3, %5 : vector<8x128xf32>
    %19 = arith.maximumf %18, %7 : vector<8x128xf32>
    %20 = arith.maximumf %19, %9 : vector<8x128xf32>
    %21 = arith.maximumf %20, %11 : vector<8x128xf32>
    %22 = arith.maximumf %21, %13 : vector<8x128xf32>
    %23 = arith.maximumf %22, %15 : vector<8x128xf32>
    %24 = arith.maximumf %23, %17 : vector<8x128xf32>
    %cst = arith.constant 0.000000e+00 : f32
    %25 = vector.broadcast %cst : f32 to vector<8x128xf32>
    %26 = arith.subf %3, %24 : vector<8x128xf32>
    %27 = math.exp %26 : vector<8x128xf32>
    %28 = arith.addf %25, %27 : vector<8x128xf32>
    %29 = arith.subf %5, %24 : vector<8x128xf32>
    %30 = math.exp %29 : vector<8x128xf32>
    %31 = arith.addf %28, %30 : vector<8x128xf32>
    %32 = arith.subf %7, %24 : vector<8x128xf32>
    %33 = math.exp %32 : vector<8x128xf32>
    %34 = arith.addf %31, %33 : vector<8x128xf32>
    %35 = arith.subf %9, %24 : vector<8x128xf32>
    %36 = math.exp %35 : vector<8x128xf32>
    %37 = arith.addf %34, %36 : vector<8x128xf32>
    %38 = arith.subf %11, %24 : vector<8x128xf32>
    %39 = math.exp %38 : vector<8x128xf32>
    %40 = arith.addf %37, %39 : vector<8x128xf32>
    %41 = arith.subf %13, %24 : vector<8x128xf32>
    %42 = math.exp %41 : vector<8x128xf32>
    %43 = arith.addf %40, %42 : vector<8x128xf32>
    %44 = arith.subf %15, %24 : vector<8x128xf32>
    %45 = math.exp %44 : vector<8x128xf32>
    %46 = arith.addf %43, %45 : vector<8x128xf32>
    %47 = arith.subf %17, %24 : vector<8x128xf32>
    %48 = math.exp %47 : vector<8x128xf32>
    %49 = arith.addf %46, %48 : vector<8x128xf32>
    %50 = math.log %49 : vector<8x128xf32>
    %51 = arith.addf %24, %50 : vector<8x128xf32>
    %cst_20 = arith.constant 0.000000e+00 : f32
    %52 = vector.broadcast %cst_20 : f32 to vector<8x128xf32>
    %cst_21 = arith.constant 0.000000e+00 : f32
    %53 = vector.broadcast %cst_21 : f32 to vector<8x128xf32>
    %54 = arith.cmpf oeq, %0, %53 : vector<8x128xf32>
    %55 = arith.select %54, %3, %52 : vector<8x128xi1>, vector<8x128xf32>
    %cst_22 = arith.constant 1.000000e+00 : f32
    %56 = vector.broadcast %cst_22 : f32 to vector<8x128xf32>
    %57 = arith.cmpf oeq, %0, %56 : vector<8x128xf32>
    %58 = arith.select %57, %5, %55 : vector<8x128xi1>, vector<8x128xf32>
    %cst_23 = arith.constant 2.000000e+00 : f32
    %59 = vector.broadcast %cst_23 : f32 to vector<8x128xf32>
    %60 = arith.cmpf oeq, %0, %59 : vector<8x128xf32>
    %61 = arith.select %60, %7, %58 : vector<8x128xi1>, vector<8x128xf32>
    %cst_24 = arith.constant 3.000000e+00 : f32
    %62 = vector.broadcast %cst_24 : f32 to vector<8x128xf32>
    %63 = arith.cmpf oeq, %0, %62 : vector<8x128xf32>
    %64 = arith.select %63, %9, %61 : vector<8x128xi1>, vector<8x128xf32>
    %cst_25 = arith.constant 4.000000e+00 : f32
    %65 = vector.broadcast %cst_25 : f32 to vector<8x128xf32>
    %66 = arith.cmpf oeq, %0, %65 : vector<8x128xf32>
    %67 = arith.select %66, %11, %64 : vector<8x128xi1>, vector<8x128xf32>
    %cst_26 = arith.constant 5.000000e+00 : f32
    %68 = vector.broadcast %cst_26 : f32 to vector<8x128xf32>
    %69 = arith.cmpf oeq, %0, %68 : vector<8x128xf32>
    %70 = arith.select %69, %13, %67 : vector<8x128xi1>, vector<8x128xf32>
    %cst_27 = arith.constant 6.000000e+00 : f32
    %71 = vector.broadcast %cst_27 : f32 to vector<8x128xf32>
    %72 = arith.cmpf oeq, %0, %71 : vector<8x128xf32>
    %73 = arith.select %72, %15, %70 : vector<8x128xi1>, vector<8x128xf32>
    %cst_28 = arith.constant 7.000000e+00 : f32
    %74 = vector.broadcast %cst_28 : f32 to vector<8x128xf32>
    %75 = arith.cmpf oeq, %0, %74 : vector<8x128xf32>
    %76 = arith.select %75, %17, %73 : vector<8x128xi1>, vector<8x128xf32>
    %77 = arith.subf %51, %76 : vector<8x128xf32>
    %cst_29 = arith.constant 0.000000e+00 : f32
    %78 = vector.broadcast %cst_29 : f32 to vector<8x128xf32>
    %79 = arith.subf %78, %77 : vector<8x128xf32>
    %80 = math.exp %79 : vector<8x128xf32>
    %cst_30 = arith.constant 1.000000e+00 : f32
    %81 = vector.broadcast %cst_30 : f32 to vector<8x128xf32>
    %82 = arith.subf %81, %80 : vector<8x128xf32>
    %cst_31 = arith.constant 1.000000e+00 : f32
    %83 = vector.broadcast %cst_31 : f32 to vector<8x128xf32>
    %84 = arith.subf %83, %80 : vector<8x128xf32>
    %85 = arith.mulf %82, %84 : vector<8x128xf32>
    %cst_32 = arith.constant 2.500000e-01 : f32
    %86 = vector.broadcast %cst_32 : f32 to vector<8x128xf32>
    %87 = arith.mulf %86, %85 : vector<8x128xf32>
    %88 = arith.mulf %87, %77 : vector<8x128xf32>
    %c0_33 = arith.constant 0 : index
    %c0_34 = arith.constant 0 : index
    %c0_35 = arith.constant 0 : index
    %89 = vector.load %arg2[%c0_33, %c0_34, %c0_35] : memref<4x8x128xf32, #tpu.memory_space<vmem>>, vector<1x8x128xf32>
    %90 = vector.shape_cast %89 : vector<1x8x128xf32> to vector<8x128xf32>
    %c1_36 = arith.constant 1 : index
    %c0_37 = arith.constant 0 : index
    %c0_38 = arith.constant 0 : index
    %91 = vector.load %arg2[%c1_36, %c0_37, %c0_38] : memref<4x8x128xf32, #tpu.memory_space<vmem>>, vector<1x8x128xf32>
    %92 = vector.shape_cast %91 : vector<1x8x128xf32> to vector<8x128xf32>
    %c2_39 = arith.constant 2 : index
    %c0_40 = arith.constant 0 : index
    %c0_41 = arith.constant 0 : index
    %93 = vector.load %arg2[%c2_39, %c0_40, %c0_41] : memref<4x8x128xf32, #tpu.memory_space<vmem>>, vector<1x8x128xf32>
    %94 = vector.shape_cast %93 : vector<1x8x128xf32> to vector<8x128xf32>
    %c3_42 = arith.constant 3 : index
    %c0_43 = arith.constant 0 : index
    %c0_44 = arith.constant 0 : index
    %95 = vector.load %arg2[%c3_42, %c0_43, %c0_44] : memref<4x8x128xf32, #tpu.memory_space<vmem>>, vector<1x8x128xf32>
    %96 = vector.shape_cast %95 : vector<1x8x128xf32> to vector<8x128xf32>
    %c0_45 = arith.constant 0 : index
    %c0_46 = arith.constant 0 : index
    %c0_47 = arith.constant 0 : index
    %97 = vector.load %arg3[%c0_45, %c0_46, %c0_47] : memref<4x8x128xf32, #tpu.memory_space<vmem>>, vector<1x8x128xf32>
    %98 = vector.shape_cast %97 : vector<1x8x128xf32> to vector<8x128xf32>
    %c1_48 = arith.constant 1 : index
    %c0_49 = arith.constant 0 : index
    %c0_50 = arith.constant 0 : index
    %99 = vector.load %arg3[%c1_48, %c0_49, %c0_50] : memref<4x8x128xf32, #tpu.memory_space<vmem>>, vector<1x8x128xf32>
    %100 = vector.shape_cast %99 : vector<1x8x128xf32> to vector<8x128xf32>
    %c2_51 = arith.constant 2 : index
    %c0_52 = arith.constant 0 : index
    %c0_53 = arith.constant 0 : index
    %101 = vector.load %arg3[%c2_51, %c0_52, %c0_53] : memref<4x8x128xf32, #tpu.memory_space<vmem>>, vector<1x8x128xf32>
    %102 = vector.shape_cast %101 : vector<1x8x128xf32> to vector<8x128xf32>
    %c3_54 = arith.constant 3 : index
    %c0_55 = arith.constant 0 : index
    %c0_56 = arith.constant 0 : index
    %103 = vector.load %arg3[%c3_54, %c0_55, %c0_56] : memref<4x8x128xf32, #tpu.memory_space<vmem>>, vector<1x8x128xf32>
    %104 = vector.shape_cast %103 : vector<1x8x128xf32> to vector<8x128xf32>
    %cst_57 = arith.constant 5.000000e-01 : f32
    %105 = vector.broadcast %cst_57 : f32 to vector<8x128xf32>
    %106 = arith.mulf %94, %105 : vector<8x128xf32>
    %107 = arith.subf %90, %106 : vector<8x128xf32>
    %cst_58 = arith.constant 5.000000e-01 : f32
    %108 = vector.broadcast %cst_58 : f32 to vector<8x128xf32>
    %109 = arith.mulf %96, %108 : vector<8x128xf32>
    %110 = arith.subf %92, %109 : vector<8x128xf32>
    %cst_59 = arith.constant 5.000000e-01 : f32
    %111 = vector.broadcast %cst_59 : f32 to vector<8x128xf32>
    %112 = arith.mulf %94, %111 : vector<8x128xf32>
    %113 = arith.addf %90, %112 : vector<8x128xf32>
    %cst_60 = arith.constant 5.000000e-01 : f32
    %114 = vector.broadcast %cst_60 : f32 to vector<8x128xf32>
    %115 = arith.mulf %96, %114 : vector<8x128xf32>
    %116 = arith.addf %92, %115 : vector<8x128xf32>
    %cst_61 = arith.constant 5.000000e-01 : f32
    %117 = vector.broadcast %cst_61 : f32 to vector<8x128xf32>
    %118 = arith.mulf %102, %117 : vector<8x128xf32>
    %119 = arith.subf %98, %118 : vector<8x128xf32>
    %cst_62 = arith.constant 5.000000e-01 : f32
    %120 = vector.broadcast %cst_62 : f32 to vector<8x128xf32>
    %121 = arith.mulf %104, %120 : vector<8x128xf32>
    %122 = arith.subf %100, %121 : vector<8x128xf32>
    %cst_63 = arith.constant 5.000000e-01 : f32
    %123 = vector.broadcast %cst_63 : f32 to vector<8x128xf32>
    %124 = arith.mulf %102, %123 : vector<8x128xf32>
    %125 = arith.addf %98, %124 : vector<8x128xf32>
    %cst_64 = arith.constant 5.000000e-01 : f32
    %126 = vector.broadcast %cst_64 : f32 to vector<8x128xf32>
    %127 = arith.mulf %104, %126 : vector<8x128xf32>
    %128 = arith.addf %100, %127 : vector<8x128xf32>
    %129 = arith.maximumf %107, %119 : vector<8x128xf32>
    %130 = arith.maximumf %110, %122 : vector<8x128xf32>
    %131 = arith.minimumf %113, %125 : vector<8x128xf32>
    %132 = arith.minimumf %116, %128 : vector<8x128xf32>
    %133 = arith.subf %131, %129 : vector<8x128xf32>
    %cst_65 = arith.constant 0.000000e+00 : f32
    %134 = vector.broadcast %cst_65 : f32 to vector<8x128xf32>
    %135 = arith.maximumf %133, %134 : vector<8x128xf32>
    %136 = arith.subf %132, %130 : vector<8x128xf32>
    %cst_66 = arith.constant 0.000000e+00 : f32
    %137 = vector.broadcast %cst_66 : f32 to vector<8x128xf32>
    %138 = arith.maximumf %136, %137 : vector<8x128xf32>
    %139 = arith.mulf %135, %138 : vector<8x128xf32>
    %140 = arith.mulf %94, %96 : vector<8x128xf32>
    %141 = arith.mulf %102, %104 : vector<8x128xf32>
    %142 = arith.addf %140, %141 : vector<8x128xf32>
    %143 = arith.subf %142, %139 : vector<8x128xf32>
    %cst_67 = arith.constant 9.99999993E-9 : f32
    %144 = vector.broadcast %cst_67 : f32 to vector<8x128xf32>
    %145 = arith.addf %143, %144 : vector<8x128xf32>
    %146 = tpu.reciprocal %145 {approx = true} : vector<8x128xf32> -> vector<8x128xf32>
    %147 = arith.mulf %139, %146 : vector<8x128xf32>
    %148 = arith.minimumf %107, %119 : vector<8x128xf32>
    %149 = arith.minimumf %110, %122 : vector<8x128xf32>
    %150 = arith.maximumf %113, %125 : vector<8x128xf32>
    %151 = arith.maximumf %116, %128 : vector<8x128xf32>
    %152 = arith.subf %150, %148 : vector<8x128xf32>
    %153 = arith.subf %151, %149 : vector<8x128xf32>
    %154 = arith.subf %90, %98 : vector<8x128xf32>
    %155 = arith.subf %90, %98 : vector<8x128xf32>
    %156 = arith.mulf %154, %155 : vector<8x128xf32>
    %157 = arith.subf %92, %100 : vector<8x128xf32>
    %158 = arith.subf %92, %100 : vector<8x128xf32>
    %159 = arith.mulf %157, %158 : vector<8x128xf32>
    %160 = arith.addf %156, %159 : vector<8x128xf32>
    %161 = arith.mulf %152, %152 : vector<8x128xf32>
    %162 = arith.mulf %153, %153 : vector<8x128xf32>
    %163 = arith.addf %161, %162 : vector<8x128xf32>
    %cst_68 = arith.constant 9.99999993E-9 : f32
    %164 = vector.broadcast %cst_68 : f32 to vector<8x128xf32>
    %165 = arith.addf %104, %164 : vector<8x128xf32>
    %166 = tpu.reciprocal %165 {approx = true} : vector<8x128xf32> -> vector<8x128xf32>
    %167 = arith.mulf %102, %166 : vector<8x128xf32>
    %cst_69 = arith.constant 0.000000e+00 : f32
    %168 = vector.broadcast %cst_69 : f32 to vector<8x128xf32>
    %169 = arith.cmpf olt, %167, %168 : vector<8x128xf32>
    %cst_70 = arith.constant -1.000000e+00 : f32
    %cst_71 = arith.constant 1.000000e+00 : f32
    %170 = vector.broadcast %cst_70 : f32 to vector<8x128xf32>
    %171 = vector.broadcast %cst_71 : f32 to vector<8x128xf32>
    %172 = arith.select %169, %170, %171 : vector<8x128xi1>, vector<8x128xf32>
    %173 = math.absf %167 : vector<8x128xf32>
    %cst_72 = arith.constant 2.41421366 : f32
    %174 = vector.broadcast %cst_72 : f32 to vector<8x128xf32>
    %175 = arith.cmpf ogt, %173, %174 : vector<8x128xf32>
    %cst_73 = arith.constant 0.414213568 : f32
    %176 = vector.broadcast %cst_73 : f32 to vector<8x128xf32>
    %177 = arith.cmpf ogt, %173, %176 : vector<8x128xf32>
    %cst_74 = arith.constant dense<true> : vector<8x128xi1>
    %178 = arith.xori %175, %cst_74 : vector<8x128xi1>
    %179 = arith.andi %177, %178 : vector<8x128xi1>
    %cst_75 = arith.constant 0.785398185 : f32
    %cst_76 = arith.constant 0.000000e+00 : f32
    %180 = vector.broadcast %cst_75 : f32 to vector<8x128xf32>
    %181 = vector.broadcast %cst_76 : f32 to vector<8x128xf32>
    %182 = arith.select %179, %180, %181 : vector<8x128xi1>, vector<8x128xf32>
    %cst_77 = arith.constant 1.57079637 : f32
    %183 = vector.broadcast %cst_77 : f32 to vector<8x128xf32>
    %184 = arith.select %175, %183, %182 : vector<8x128xi1>, vector<8x128xf32>
    %cst_78 = arith.constant 1.000000e-30 : f32
    %185 = vector.broadcast %cst_78 : f32 to vector<8x128xf32>
    %186 = arith.addf %173, %185 : vector<8x128xf32>
    %187 = tpu.reciprocal %186 {approx = true} : vector<8x128xf32> -> vector<8x128xf32>
    %cst_79 = arith.constant 0.000000e+00 : f32
    %188 = vector.broadcast %cst_79 : f32 to vector<8x128xf32>
    %189 = arith.subf %188, %187 : vector<8x128xf32>
    %cst_80 = arith.constant 1.000000e+00 : f32
    %190 = vector.broadcast %cst_80 : f32 to vector<8x128xf32>
    %191 = arith.subf %173, %190 : vector<8x128xf32>
    %cst_81 = arith.constant 1.000000e+00 : f32
    %192 = vector.broadcast %cst_81 : f32 to vector<8x128xf32>
    %193 = arith.addf %173, %192 : vector<8x128xf32>
    %194 = tpu.reciprocal %193 {approx = true} : vector<8x128xf32> -> vector<8x128xf32>
    %195 = arith.mulf %191, %194 : vector<8x128xf32>
    %196 = arith.select %179, %195, %173 : vector<8x128xi1>, vector<8x128xf32>
    %197 = arith.select %175, %189, %196 : vector<8x128xi1>, vector<8x128xf32>
    %198 = arith.mulf %197, %197 : vector<8x128xf32>
    %cst_82 = arith.constant 0.0805374458 : f32
    %199 = vector.broadcast %cst_82 : f32 to vector<8x128xf32>
    %200 = arith.mulf %199, %198 : vector<8x128xf32>
    %cst_83 = arith.constant 0.138776854 : f32
    %201 = vector.broadcast %cst_83 : f32 to vector<8x128xf32>
    %202 = arith.subf %200, %201 : vector<8x128xf32>
    %203 = arith.mulf %202, %198 : vector<8x128xf32>
    %cst_84 = arith.constant 0.199777111 : f32
    %204 = vector.broadcast %cst_84 : f32 to vector<8x128xf32>
    %205 = arith.addf %203, %204 : vector<8x128xf32>
    %206 = arith.mulf %205, %198 : vector<8x128xf32>
    %cst_85 = arith.constant 0.333329499 : f32
    %207 = vector.broadcast %cst_85 : f32 to vector<8x128xf32>
    %208 = arith.subf %206, %207 : vector<8x128xf32>
    %209 = arith.addf %184, %197 : vector<8x128xf32>
    %210 = arith.mulf %197, %198 : vector<8x128xf32>
    %211 = arith.mulf %210, %208 : vector<8x128xf32>
    %212 = arith.addf %209, %211 : vector<8x128xf32>
    %213 = arith.mulf %172, %212 : vector<8x128xf32>
    %cst_86 = arith.constant 9.99999993E-9 : f32
    %214 = vector.broadcast %cst_86 : f32 to vector<8x128xf32>
    %215 = arith.addf %96, %214 : vector<8x128xf32>
    %216 = tpu.reciprocal %215 {approx = true} : vector<8x128xf32> -> vector<8x128xf32>
    %217 = arith.mulf %94, %216 : vector<8x128xf32>
    %cst_87 = arith.constant 0.000000e+00 : f32
    %218 = vector.broadcast %cst_87 : f32 to vector<8x128xf32>
    %219 = arith.cmpf olt, %217, %218 : vector<8x128xf32>
    %cst_88 = arith.constant -1.000000e+00 : f32
    %cst_89 = arith.constant 1.000000e+00 : f32
    %220 = vector.broadcast %cst_88 : f32 to vector<8x128xf32>
    %221 = vector.broadcast %cst_89 : f32 to vector<8x128xf32>
    %222 = arith.select %219, %220, %221 : vector<8x128xi1>, vector<8x128xf32>
    %223 = math.absf %217 : vector<8x128xf32>
    %cst_90 = arith.constant 2.41421366 : f32
    %224 = vector.broadcast %cst_90 : f32 to vector<8x128xf32>
    %225 = arith.cmpf ogt, %223, %224 : vector<8x128xf32>
    %cst_91 = arith.constant 0.414213568 : f32
    %226 = vector.broadcast %cst_91 : f32 to vector<8x128xf32>
    %227 = arith.cmpf ogt, %223, %226 : vector<8x128xf32>
    %cst_92 = arith.constant dense<true> : vector<8x128xi1>
    %228 = arith.xori %225, %cst_92 : vector<8x128xi1>
    %229 = arith.andi %227, %228 : vector<8x128xi1>
    %cst_93 = arith.constant 0.785398185 : f32
    %cst_94 = arith.constant 0.000000e+00 : f32
    %230 = vector.broadcast %cst_93 : f32 to vector<8x128xf32>
    %231 = vector.broadcast %cst_94 : f32 to vector<8x128xf32>
    %232 = arith.select %229, %230, %231 : vector<8x128xi1>, vector<8x128xf32>
    %cst_95 = arith.constant 1.57079637 : f32
    %233 = vector.broadcast %cst_95 : f32 to vector<8x128xf32>
    %234 = arith.select %225, %233, %232 : vector<8x128xi1>, vector<8x128xf32>
    %cst_96 = arith.constant 1.000000e-30 : f32
    %235 = vector.broadcast %cst_96 : f32 to vector<8x128xf32>
    %236 = arith.addf %223, %235 : vector<8x128xf32>
    %237 = tpu.reciprocal %236 {approx = true} : vector<8x128xf32> -> vector<8x128xf32>
    %cst_97 = arith.constant 0.000000e+00 : f32
    %238 = vector.broadcast %cst_97 : f32 to vector<8x128xf32>
    %239 = arith.subf %238, %237 : vector<8x128xf32>
    %cst_98 = arith.constant 1.000000e+00 : f32
    %240 = vector.broadcast %cst_98 : f32 to vector<8x128xf32>
    %241 = arith.subf %223, %240 : vector<8x128xf32>
    %cst_99 = arith.constant 1.000000e+00 : f32
    %242 = vector.broadcast %cst_99 : f32 to vector<8x128xf32>
    %243 = arith.addf %223, %242 : vector<8x128xf32>
    %244 = tpu.reciprocal %243 {approx = true} : vector<8x128xf32> -> vector<8x128xf32>
    %245 = arith.mulf %241, %244 : vector<8x128xf32>
    %246 = arith.select %229, %245, %223 : vector<8x128xi1>, vector<8x128xf32>
    %247 = arith.select %225, %239, %246 : vector<8x128xi1>, vector<8x128xf32>
    %248 = arith.mulf %247, %247 : vector<8x128xf32>
    %cst_100 = arith.constant 0.0805374458 : f32
    %249 = vector.broadcast %cst_100 : f32 to vector<8x128xf32>
    %250 = arith.mulf %249, %248 : vector<8x128xf32>
    %cst_101 = arith.constant 0.138776854 : f32
    %251 = vector.broadcast %cst_101 : f32 to vector<8x128xf32>
    %252 = arith.subf %250, %251 : vector<8x128xf32>
    %253 = arith.mulf %252, %248 : vector<8x128xf32>
    %cst_102 = arith.constant 0.199777111 : f32
    %254 = vector.broadcast %cst_102 : f32 to vector<8x128xf32>
    %255 = arith.addf %253, %254 : vector<8x128xf32>
    %256 = arith.mulf %255, %248 : vector<8x128xf32>
    %cst_103 = arith.constant 0.333329499 : f32
    %257 = vector.broadcast %cst_103 : f32 to vector<8x128xf32>
    %258 = arith.subf %256, %257 : vector<8x128xf32>
    %259 = arith.addf %234, %247 : vector<8x128xf32>
    %260 = arith.mulf %247, %248 : vector<8x128xf32>
    %261 = arith.mulf %260, %258 : vector<8x128xf32>
    %262 = arith.addf %259, %261 : vector<8x128xf32>
    %263 = arith.mulf %222, %262 : vector<8x128xf32>
    %264 = arith.subf %213, %263 : vector<8x128xf32>
    %cst_104 = arith.constant 0.405284733 : f32
    %265 = vector.broadcast %cst_104 : f32 to vector<8x128xf32>
    %266 = arith.mulf %265, %264 : vector<8x128xf32>
    %267 = arith.mulf %266, %264 : vector<8x128xf32>
    %cst_105 = arith.constant 1.000000e+00 : f32
    %268 = vector.broadcast %cst_105 : f32 to vector<8x128xf32>
    %269 = arith.subf %268, %147 : vector<8x128xf32>
    %270 = arith.addf %269, %267 : vector<8x128xf32>
    %cst_106 = arith.constant 9.99999993E-9 : f32
    %271 = vector.broadcast %cst_106 : f32 to vector<8x128xf32>
    %272 = arith.addf %270, %271 : vector<8x128xf32>
    %273 = tpu.reciprocal %272 {approx = true} : vector<8x128xf32> -> vector<8x128xf32>
    %274 = arith.mulf %267, %273 : vector<8x128xf32>
    %cst_107 = arith.constant 9.99999993E-9 : f32
    %275 = vector.broadcast %cst_107 : f32 to vector<8x128xf32>
    %276 = arith.addf %163, %275 : vector<8x128xf32>
    %277 = tpu.reciprocal %276 {approx = true} : vector<8x128xf32> -> vector<8x128xf32>
    %278 = arith.mulf %160, %277 : vector<8x128xf32>
    %279 = arith.subf %147, %278 : vector<8x128xf32>
    %280 = arith.mulf %274, %267 : vector<8x128xf32>
    %281 = arith.subf %279, %280 : vector<8x128xf32>
    %cst_108 = arith.constant 1.000000e+00 : f32
    %282 = vector.broadcast %cst_108 : f32 to vector<8x128xf32>
    %283 = arith.subf %282, %281 : vector<8x128xf32>
    %284 = arith.mulf %1, %88 : vector<8x128xf32>
    %c0_109 = arith.constant 0 : index
    %c0_110 = arith.constant 0 : index
    %c0_111 = arith.constant 0 : index
    %285 = vector.load %arg6[%c0_109, %c0_110, %c0_111] : memref<2x8x128xf32, #tpu.memory_space<vmem>>, vector<1x8x128xf32>
    %286 = vector.shape_cast %285 : vector<1x8x128xf32> to vector<8x128xf32>
    %287 = vector.shape_cast %284 : vector<8x128xf32> to vector<1x8x128xf32>
    tpu.vector_store %arg6[%c0_109, %c0_110, %c0_111], %287 {strides = array<i32>} : memref<2x8x128xf32, #tpu.memory_space<vmem>>, vector<1x8x128xf32>,
    %288 = arith.mulf %1, %283 : vector<8x128xf32>
    %c1_112 = arith.constant 1 : index
    %c0_113 = arith.constant 0 : index
    %c0_114 = arith.constant 0 : index
    %289 = vector.load %arg6[%c1_112, %c0_113, %c0_114] : memref<2x8x128xf32, #tpu.memory_space<vmem>>, vector<1x8x128xf32>
    %290 = vector.shape_cast %289 : vector<1x8x128xf32> to vector<8x128xf32>
    %291 = vector.shape_cast %288 : vector<8x128xf32> to vector<1x8x128xf32>
    tpu.vector_store %arg6[%c1_112, %c0_113, %c0_114], %291 {strides = array<i32>} : memref<2x8x128xf32, #tpu.memory_space<vmem>>, vector<1x8x128xf32>,
    return
  }
  func.func @transform_0(%arg0: i32) -> (i32, i32, i32) {
    %c0_i32 = arith.constant 0 : i32
    %c0_i32_0 = arith.constant 0 : i32
    %c0_i32_1 = arith.constant 0 : i32
    %c0_i32_2 = arith.constant 0 : i32
    return %c0_i32, %c0_i32_0, %c0_i32_1 : i32, i32, i32
  }
  func.func @transform_1(%arg0: i32) -> (i32, i32, i32) {
    %c0_i32 = arith.constant 0 : i32
    %c0_i32_0 = arith.constant 0 : i32
    %c0_i32_1 = arith.constant 0 : i32
    %c0_i32_2 = arith.constant 0 : i32
    return %c0_i32, %c0_i32_0, %c0_i32_1 : i32, i32, i32
  }
  func.func @transform_2(%arg0: i32) -> (i32, i32, i32) {
    %c0_i32 = arith.constant 0 : i32
    %c0_i32_0 = arith.constant 0 : i32
    %c0_i32_1 = arith.constant 0 : i32
    %c0_i32_2 = arith.constant 0 : i32
    return %c0_i32, %c0_i32_0, %c0_i32_1 : i32, i32, i32
  }
  func.func @transform_3(%arg0: i32) -> (i32, i32) {
    %c0_i32 = arith.constant 0 : i32
    %c0_i32_0 = arith.constant 0 : i32
    %c0_i32_1 = arith.constant 0 : i32
    return %c0_i32, %c0_i32_0 : i32, i32
  }
  func.func @transform_4(%arg0: i32) -> (i32, i32) {
    %c0_i32 = arith.constant 0 : i32
    %c0_i32_0 = arith.constant 0 : i32
    %c0_i32_1 = arith.constant 0 : i32
    return %c0_i32, %c0_i32_0 : i32, i32
  }
  func.func @transform_5(%arg0: i32) -> (i32, i32, i32) {
    %c0_i32 = arith.constant 0 : i32
    %c0_i32_0 = arith.constant 0 : i32
    %c0_i32_1 = arith.constant 0 : i32
    %c0_i32_2 = arith.constant 0 : i32
    return %c0_i32, %c0_i32_0, %c0_i32_1 : i32, i32, i32
  }
}

module attributes {stable_mosaic.version = 11 : i64} {
  func.func @kernel(%arg0: i32, %arg1: i32, %arg2: memref<128x128xf32, #tpu.memory_space<vmem>>, %arg3: memref<128x128xf32, #tpu.memory_space<vmem>>, %arg4: memref<1x128x128xf32, #tpu.memory_space<vmem>>) attributes {dimension_semantics = [#tpu.dimension_semantics<parallel>, #tpu.dimension_semantics<arbitrary>], iteration_bounds = array<i64: 1, 1>, scalar_prefetch = 0 : i64, scratch_operands = 0 : i64, tpu.core_type = #tpu.core_type<tc>, window_params = [{transform_indices = @transform_0, window_bounds = array<i64: 128, 128>}, {transform_indices = @transform_1, window_bounds = array<i64: 128, 128>}, {transform_indices = @transform_2, window_bounds = array<i64: 1, 128, 128>}]} {
    %c1_i32 = arith.constant 1 : i32
    %0 = arith.muli %arg1, %c1_i32 : i32
    %1 = arith.addi %0, %arg0 : i32
    %c0_i32 = arith.constant 0 : i32
    %2 = arith.cmpi eq, %arg1, %c0_i32 : i32
    %3 = arith.extui %2 : i1 to i32
    %c0_i32_0 = arith.constant 0 : i32
    %4 = arith.cmpi ne, %3, %c0_i32_0 : i32
    scf.if %4 {
      %cst_9 = arith.constant 0.000000e+00 : f32
      %25 = vector.broadcast %cst_9 : f32 to vector<1x128x128xf32>
      %c0_10 = arith.constant 0 : index
      %c0_11 = arith.constant 0 : index
      %c0_12 = arith.constant 0 : index
      %26 = vector.load %arg4[%c0_10, %c0_11, %c0_12] : memref<1x128x128xf32, #tpu.memory_space<vmem>>, vector<1x128x128xf32>
      tpu.vector_store %arg4[%c0_10, %c0_11, %c0_12], %25 {strides = array<i32>} : memref<1x128x128xf32, #tpu.memory_space<vmem>>, vector<1x128x128xf32>,
    } else {
    }
    %c0 = arith.constant 0 : index
    %c0_1 = arith.constant 0 : index
    %5 = vector.load %arg2[%c0, %c0_1] : memref<128x128xf32, #tpu.memory_space<vmem>>, vector<128x128xf32>
    %c0_2 = arith.constant 0 : index
    %c0_3 = arith.constant 0 : index
    %6 = vector.load %arg3[%c0_2, %c0_3] : memref<128x128xf32, #tpu.memory_space<vmem>>, vector<128x128xf32>
    %cst = arith.constant 0.000000e+00 : f32
    %7 = vector.broadcast %cst : f32 to vector<128x128xf32>
    %8 = arith.maximumf %5, %7 : vector<128x128xf32>
    %9 = arith.mulf %5, %6 : vector<128x128xf32>
    %10 = arith.subf %8, %9 : vector<128x128xf32>
    %11 = math.absf %5 : vector<128x128xf32>
    %cst_4 = arith.constant 0.000000e+00 : f32
    %12 = vector.broadcast %cst_4 : f32 to vector<128x128xf32>
    %13 = arith.subf %12, %11 : vector<128x128xf32>
    %14 = math.exp %13 : vector<128x128xf32>
    %cst_5 = arith.constant 1.000000e+00 : f32
    %15 = vector.broadcast %cst_5 : f32 to vector<128x128xf32>
    %16 = arith.addf %15, %14 : vector<128x128xf32>
    %17 = math.log %16 : vector<128x128xf32>
    %18 = arith.addf %10, %17 : vector<128x128xf32>
    %c0_i32_6 = arith.constant 0 : i32
    %19 = arith.cmpi eq, %1, %c0_i32_6 : i32
    %true = arith.constant true
    %20 = arith.xori %19, %true : i1
    %21 = arith.extui %20 : i1 to i32
    %c0_i32_7 = arith.constant 0 : i32
    %22 = arith.cmpi ne, %21, %c0_i32_7 : i32
    scf.if %22 {
      %c0_9 = arith.constant 0 : index
      %c0_10 = arith.constant 0 : index
      %c0_11 = arith.constant 0 : index
      %25 = vector.load %arg4[%c0_9, %c0_10, %c0_11] : memref<1x128x128xf32, #tpu.memory_space<vmem>>, vector<1x128x128xf32>
      %26 = vector.shape_cast %25 : vector<1x128x128xf32> to vector<128x128xf32>
      %27 = arith.addf %26, %18 : vector<128x128xf32>
      %c0_12 = arith.constant 0 : index
      %c0_13 = arith.constant 0 : index
      %c0_14 = arith.constant 0 : index
      %28 = vector.load %arg4[%c0_12, %c0_13, %c0_14] : memref<1x128x128xf32, #tpu.memory_space<vmem>>, vector<1x128x128xf32>
      %29 = vector.shape_cast %28 : vector<1x128x128xf32> to vector<128x128xf32>
      %30 = vector.shape_cast %27 : vector<128x128xf32> to vector<1x128x128xf32>
      tpu.vector_store %arg4[%c0_12, %c0_13, %c0_14], %30 {strides = array<i32>} : memref<1x128x128xf32, #tpu.memory_space<vmem>>, vector<1x128x128xf32>,
    } else {
    }
    %23 = arith.extui %19 : i1 to i32
    %c0_i32_8 = arith.constant 0 : i32
    %24 = arith.cmpi ne, %23, %c0_i32_8 : i32
    scf.if %24 {
      %25 = tpu.iota {dimensions = array<i32: 0>} : vector<128x128xi32>
      %26 = tpu.iota {dimensions = array<i32: 1>} : vector<128x128xi32>
      %c128_i32 = arith.constant 128 : i32
      %27 = arith.muli %1, %c128_i32 : i32
      %28 = vector.broadcast %27 : i32 to vector<128x128xi32>
      %29 = arith.addi %28, %25 : vector<128x128xi32>
      %c128_i32_9 = arith.constant 128 : i32
      %30 = vector.broadcast %c128_i32_9 : i32 to vector<128x128xi32>
      %31 = arith.muli %29, %30 : vector<128x128xi32>
      %32 = arith.addi %31, %26 : vector<128x128xi32>
      %c16000_i32 = arith.constant 16000 : i32
      %33 = vector.broadcast %c16000_i32 : i32 to vector<128x128xi32>
      %34 = arith.cmpi slt, %32, %33 : vector<128x128xi32>
      %35 = arith.extui %34 : vector<128x128xi1> to vector<128x128xi32>
      %36 = arith.sitofp %35 : vector<128x128xi32> to vector<128x128xf32>
      %c0_10 = arith.constant 0 : index
      %c0_11 = arith.constant 0 : index
      %c0_12 = arith.constant 0 : index
      %37 = vector.load %arg4[%c0_10, %c0_11, %c0_12] : memref<1x128x128xf32, #tpu.memory_space<vmem>>, vector<1x128x128xf32>
      %38 = vector.shape_cast %37 : vector<1x128x128xf32> to vector<128x128xf32>
      %39 = arith.mulf %36, %18 : vector<128x128xf32>
      %40 = arith.addf %38, %39 : vector<128x128xf32>
      %c0_13 = arith.constant 0 : index
      %c0_14 = arith.constant 0 : index
      %c0_15 = arith.constant 0 : index
      %41 = vector.load %arg4[%c0_13, %c0_14, %c0_15] : memref<1x128x128xf32, #tpu.memory_space<vmem>>, vector<1x128x128xf32>
      %42 = vector.shape_cast %41 : vector<1x128x128xf32> to vector<128x128xf32>
      %43 = vector.shape_cast %40 : vector<128x128xf32> to vector<1x128x128xf32>
      tpu.vector_store %arg4[%c0_13, %c0_14, %c0_15], %43 {strides = array<i32>} : memref<1x128x128xf32, #tpu.memory_space<vmem>>, vector<1x128x128xf32>,
    } else {
    }
    return
  }
  func.func @transform_0(%arg0: i32, %arg1: i32) -> (i32, i32) {
    %c1_i32 = arith.constant 1 : i32
    %0 = arith.muli %arg1, %c1_i32 : i32
    %1 = arith.addi %0, %arg0 : i32
    %c0_i32 = arith.constant 0 : i32
    %c0_i32_0 = arith.constant 0 : i32
    return %1, %c0_i32 : i32, i32
  }
  func.func @transform_1(%arg0: i32, %arg1: i32) -> (i32, i32) {
    %c1_i32 = arith.constant 1 : i32
    %0 = arith.muli %arg1, %c1_i32 : i32
    %1 = arith.addi %0, %arg0 : i32
    %c0_i32 = arith.constant 0 : i32
    %c0_i32_0 = arith.constant 0 : i32
    return %1, %c0_i32 : i32, i32
  }
  func.func @transform_2(%arg0: i32, %arg1: i32) -> (i32, i32, i32) {
    %c0_i32 = arith.constant 0 : i32
    %c0_i32_0 = arith.constant 0 : i32
    %c0_i32_1 = arith.constant 0 : i32
    return %arg0, %c0_i32, %c0_i32_0 : i32, i32, i32
  }
}

module attributes {stable_mosaic.version = 11 : i64} {
  func.func @kernel(%arg0: i32, %arg1: i32, %arg2: memref<16x128xf32, #tpu.memory_space<vmem>>, %arg3: memref<16x128xf32, #tpu.memory_space<vmem>>, %arg4: memref<1x16x128xf32, #tpu.memory_space<vmem>>) attributes {dimension_semantics = [#tpu.dimension_semantics<parallel>, #tpu.dimension_semantics<arbitrary>], iteration_bounds = array<i64: 1, 1>, scalar_prefetch = 0 : i64, scratch_operands = 0 : i64, tpu.core_type = #tpu.core_type<tc>, window_params = [{transform_indices = @transform_0, window_bounds = array<i64: 16, 128>}, {transform_indices = @transform_1, window_bounds = array<i64: 16, 128>}, {transform_indices = @transform_2, window_bounds = array<i64: 1, 16, 128>}]} {
    %c1_i32 = arith.constant 1 : i32
    %0 = arith.muli %arg1, %c1_i32 : i32
    %1 = arith.addi %0, %arg0 : i32
    %c0_i32 = arith.constant 0 : i32
    %2 = arith.cmpi eq, %arg1, %c0_i32 : i32
    %3 = arith.extui %2 : i1 to i32
    %c0_i32_0 = arith.constant 0 : i32
    %4 = arith.cmpi ne, %3, %c0_i32_0 : i32
    scf.if %4 {
      %cst_9 = arith.constant 0.000000e+00 : f32
      %25 = vector.broadcast %cst_9 : f32 to vector<1x16x128xf32>
      %c0_10 = arith.constant 0 : index
      %c0_11 = arith.constant 0 : index
      %c0_12 = arith.constant 0 : index
      %26 = vector.load %arg4[%c0_10, %c0_11, %c0_12] : memref<1x16x128xf32, #tpu.memory_space<vmem>>, vector<1x16x128xf32>
      tpu.vector_store %arg4[%c0_10, %c0_11, %c0_12], %25 {strides = array<i32>} : memref<1x16x128xf32, #tpu.memory_space<vmem>>, vector<1x16x128xf32>,
    } else {
    }
    %c0 = arith.constant 0 : index
    %c0_1 = arith.constant 0 : index
    %5 = vector.load %arg2[%c0, %c0_1] : memref<16x128xf32, #tpu.memory_space<vmem>>, vector<16x128xf32>
    %c0_2 = arith.constant 0 : index
    %c0_3 = arith.constant 0 : index
    %6 = vector.load %arg3[%c0_2, %c0_3] : memref<16x128xf32, #tpu.memory_space<vmem>>, vector<16x128xf32>
    %cst = arith.constant 0.000000e+00 : f32
    %7 = vector.broadcast %cst : f32 to vector<16x128xf32>
    %8 = arith.maximumf %5, %7 : vector<16x128xf32>
    %9 = arith.mulf %5, %6 : vector<16x128xf32>
    %10 = arith.subf %8, %9 : vector<16x128xf32>
    %11 = math.absf %5 : vector<16x128xf32>
    %cst_4 = arith.constant 0.000000e+00 : f32
    %12 = vector.broadcast %cst_4 : f32 to vector<16x128xf32>
    %13 = arith.subf %12, %11 : vector<16x128xf32>
    %14 = math.exp %13 : vector<16x128xf32>
    %cst_5 = arith.constant 1.000000e+00 : f32
    %15 = vector.broadcast %cst_5 : f32 to vector<16x128xf32>
    %16 = arith.addf %15, %14 : vector<16x128xf32>
    %17 = math.log %16 : vector<16x128xf32>
    %18 = arith.addf %10, %17 : vector<16x128xf32>
    %c0_i32_6 = arith.constant 0 : i32
    %19 = arith.cmpi eq, %1, %c0_i32_6 : i32
    %true = arith.constant true
    %20 = arith.xori %19, %true : i1
    %21 = arith.extui %20 : i1 to i32
    %c0_i32_7 = arith.constant 0 : i32
    %22 = arith.cmpi ne, %21, %c0_i32_7 : i32
    scf.if %22 {
      %c0_9 = arith.constant 0 : index
      %c0_10 = arith.constant 0 : index
      %c0_11 = arith.constant 0 : index
      %25 = vector.load %arg4[%c0_9, %c0_10, %c0_11] : memref<1x16x128xf32, #tpu.memory_space<vmem>>, vector<1x16x128xf32>
      %26 = vector.shape_cast %25 : vector<1x16x128xf32> to vector<16x128xf32>
      %27 = arith.addf %26, %18 : vector<16x128xf32>
      %c0_12 = arith.constant 0 : index
      %c0_13 = arith.constant 0 : index
      %c0_14 = arith.constant 0 : index
      %28 = vector.load %arg4[%c0_12, %c0_13, %c0_14] : memref<1x16x128xf32, #tpu.memory_space<vmem>>, vector<1x16x128xf32>
      %29 = vector.shape_cast %28 : vector<1x16x128xf32> to vector<16x128xf32>
      %30 = vector.shape_cast %27 : vector<16x128xf32> to vector<1x16x128xf32>
      tpu.vector_store %arg4[%c0_12, %c0_13, %c0_14], %30 {strides = array<i32>} : memref<1x16x128xf32, #tpu.memory_space<vmem>>, vector<1x16x128xf32>,
    } else {
    }
    %23 = arith.extui %19 : i1 to i32
    %c0_i32_8 = arith.constant 0 : i32
    %24 = arith.cmpi ne, %23, %c0_i32_8 : i32
    scf.if %24 {
      %25 = tpu.iota {dimensions = array<i32: 0>} : vector<16x128xi32>
      %26 = tpu.iota {dimensions = array<i32: 1>} : vector<16x128xi32>
      %c16_i32 = arith.constant 16 : i32
      %27 = arith.muli %1, %c16_i32 : i32
      %28 = vector.broadcast %27 : i32 to vector<16x128xi32>
      %29 = arith.addi %28, %25 : vector<16x128xi32>
      %c128_i32 = arith.constant 128 : i32
      %30 = vector.broadcast %c128_i32 : i32 to vector<16x128xi32>
      %31 = arith.muli %29, %30 : vector<16x128xi32>
      %32 = arith.addi %31, %26 : vector<16x128xi32>
      %c2000_i32 = arith.constant 2000 : i32
      %33 = vector.broadcast %c2000_i32 : i32 to vector<16x128xi32>
      %34 = arith.cmpi slt, %32, %33 : vector<16x128xi32>
      %35 = arith.extui %34 : vector<16x128xi1> to vector<16x128xi32>
      %36 = arith.sitofp %35 : vector<16x128xi32> to vector<16x128xf32>
      %c0_9 = arith.constant 0 : index
      %c0_10 = arith.constant 0 : index
      %c0_11 = arith.constant 0 : index
      %37 = vector.load %arg4[%c0_9, %c0_10, %c0_11] : memref<1x16x128xf32, #tpu.memory_space<vmem>>, vector<1x16x128xf32>
      %38 = vector.shape_cast %37 : vector<1x16x128xf32> to vector<16x128xf32>
      %39 = arith.mulf %36, %18 : vector<16x128xf32>
      %40 = arith.addf %38, %39 : vector<16x128xf32>
      %c0_12 = arith.constant 0 : index
      %c0_13 = arith.constant 0 : index
      %c0_14 = arith.constant 0 : index
      %41 = vector.load %arg4[%c0_12, %c0_13, %c0_14] : memref<1x16x128xf32, #tpu.memory_space<vmem>>, vector<1x16x128xf32>
      %42 = vector.shape_cast %41 : vector<1x16x128xf32> to vector<16x128xf32>
      %43 = vector.shape_cast %40 : vector<16x128xf32> to vector<1x16x128xf32>
      tpu.vector_store %arg4[%c0_12, %c0_13, %c0_14], %43 {strides = array<i32>} : memref<1x16x128xf32, #tpu.memory_space<vmem>>, vector<1x16x128xf32>,
    } else {
    }
    return
  }
  func.func @transform_0(%arg0: i32, %arg1: i32) -> (i32, i32) {
    %c1_i32 = arith.constant 1 : i32
    %0 = arith.muli %arg1, %c1_i32 : i32
    %1 = arith.addi %0, %arg0 : i32
    %c0_i32 = arith.constant 0 : i32
    %c0_i32_0 = arith.constant 0 : i32
    return %1, %c0_i32 : i32, i32
  }
  func.func @transform_1(%arg0: i32, %arg1: i32) -> (i32, i32) {
    %c1_i32 = arith.constant 1 : i32
    %0 = arith.muli %arg1, %c1_i32 : i32
    %1 = arith.addi %0, %arg0 : i32
    %c0_i32 = arith.constant 0 : i32
    %c0_i32_0 = arith.constant 0 : i32
    return %1, %c0_i32 : i32, i32
  }
  func.func @transform_2(%arg0: i32, %arg1: i32) -> (i32, i32, i32) {
    %c0_i32 = arith.constant 0 : i32
    %c0_i32_0 = arith.constant 0 : i32
    %c0_i32_1 = arith.constant 0 : i32
    return %arg0, %c0_i32, %c0_i32_0 : i32, i32, i32
  }
}

</mosaic_0001>

<bundles_post_ra>
// kernel: fast_detection_loss.5
= control target key start
LH: loop header
LB: loop body
LE: loop exit
PB: predicated region body
PF: predicated region fallthrough
CT: control target
= control target key end

     0   :  { %vm310_vm11 = vmmov 1   ;;  %s588_s0 = inlined_call_operand.vmem [shape: f32[8,8,128], index: 0, kind: input, shape index: {}]   ;;  %s589_s2 = inlined_call_operand.vmem [shape: f32[4,8,128], index: 2, kind: input, shape index: {}]   ;;  %s590_s1 = inlined_call_operand.vmem [shape: f32[4,8,128], index: 1, kind: input, shape index: {}]   ;;  %s591_s3 = inlined_call_operand.vmem [shape: f32[8,128], index: 3, kind: input, shape index: {}]   ;;  %s592_s4 = inlined_call_operand.vmem [shape: f32[8,128], index: 4, kind: input, shape index: {}]   ;;  %s593_s5 = inlined_call_operand.vmem [shape: f32[2,8,128], index: 5, kind: output, shape index: {}]  }
   0x1   :  { %v346_v0 = vld [vmem:[%s588_s0] sm:$0xff]  ;;  %v351_v1 = vld [vmem:[%s588_s0 + $0x8] sm:$0xff]  ;;  %v356_v2 = vld [vmem:[%s588_s0 + $0x10] sm:$0xff] }
   0x2   :  { %v37_v3 = vmax.f32 %v346_v0, %v351_v1  ;;  %v363_v4 = vld [vmem:[%s588_s0 + $0x18] sm:$0xff]  ;;  %v369_v6 = vld [vmem:[%s588_s0 + $0x20] sm:$0xff]  ;;  %v375_v8 = vld [vmem:[%s588_s0 + $0x28] sm:$0xff] }
   0x3   :  { %v381_v10 = vld [vmem:[%s588_s0 + $0x30] sm:$0xff]  ;;  %v387_v12 = vld [vmem:[%s588_s0 + $0x38] sm:$0xff]  ;;  %v424_v40 = vld [vmem:[%s591_s3] sm:$0xff] }
   0x4   :  { %v38_v5 = vmax.f32 %v37_v3, %v356_v2  ;;  %v410_v27 = vld [vmem:[%s589_s2 + $0x18] sm:$0xff]  ;;  %v257_v42 = vld [vmem:[%s590_s1 + $0x10] sm:$0xff]  ;;  %vm79_vm0 = vcmp.eq.f32.partialorder %v424_v40, 0.0  ;;  %v437_v48 = vld [vmem:[%s590_s1] sm:$0xff]  ;;  %vm81_vm1 = vcmp.eq.f32.partialorder %v424_v40, 1.0  ;;  %vm83_vm2 = vcmp.eq.f32.partialorder %v424_v40, 2.0 }
   0x5   :  { %v417_v30 = vld [vmem:[%s590_s1 + $0x18] sm:$0xff]  ;;  %v159_v32 = vadd.f32 1e-08, %v410_v27  ;;  %v260_v44 = vld [vmem:[%s589_s2 + $0x10] sm:$0xff]  ;;  %v117_v45 = vmul.f32 0.5, %v257_v42  ;;  %v442_v49 = vld [vmem:[%s590_s1 + $0x8] sm:$0xff] }
   0x6   :  { %v39_v7 = vmax.f32 %v38_v5, %v363_v4  ;;  %v192_v33 = vadd.f32 1e-08, %v417_v30  ;;  %v119_v46 = vmul.f32 0.5, %v417_v30  ;;  %v123_v50 = vmul.f32 0.5, %v260_v44  ;;  %v447_v52 = vld [vmem:[%s589_s2] sm:$0xff]  ;;  %v454_v56 = vld [vmem:[%s589_s2 + $0x8] sm:$0xff] }
   0x7   :  { %v125_v53 = vmul.f32 0.5, %v410_v27  ;;  %v80_v58 = vsel %vm79_vm0, %v346_v0, 0.0  ;;  %v458_v59 = vsub.f32 %v437_v48, %v117_v45  ;;  %v464_v61 = vadd.f32 %v117_v45, %v437_v48 }
   0x8   :  { %v40_v9 = vmax.f32 %v39_v7, %v369_v6  ;;  %v461_v60 = vsub.f32 %v442_v49, %v119_v46  ;;  %v467_v3 = vadd.f32 %v442_v49, %v119_v46  ;;  %v470_v5 = vsub.f32 %v447_v52, %v123_v50 }
   0x9   :  { %vm85_vm3 = vcmp.eq.f32.partialorder %v424_v40, 3.0  ;;  %vm87_vm4 = vcmp.eq.f32.partialorder %v424_v40, 4.0  ;;  %vm89_vm5 = vcmp.eq.f32.partialorder %v424_v40, 5.0  ;;  %vm91_vm6 = vcmp.eq.f32.partialorder %v424_v40, 6.0 }
   0xa   :  { %v41_v11 = vmax.f32 %v40_v9, %v375_v8  ;;  %v475_v9 = vsub.f32 %v454_v56, %v125_v53  ;;  %vm93_vm9 = vcmp.eq.f32.partialorder %v424_v40, 7.0 }
   0xc   :  { %v42_v13 = vmax.f32 %v41_v11, %v381_v10  ;;  %v478_v11 = vadd.f32 %v123_v50, %v447_v52 }
   0xe   :  { %v391_v14 = vmax.f32 %v42_v13, %v387_v12  ;;  %v481_v13 = vadd.f32 %v454_v56, %v125_v53 }
  0x10   :  { %v44_v15 = vsub.f32 %v346_v0, %v391_v14  ;;  %v48_v16 = vsub.f32 %v351_v1, %v391_v14  ;;  %v52_v17 = vsub.f32 %v356_v2, %v391_v14  ;;  %v56_v18 = vsub.f32 %v363_v4, %v391_v14 }
  0x11   :  { %v60_v19 = vsub.f32 %v369_v6, %v391_v14  ;;  %v64_v24 = vsub.f32 %v375_v8, %v391_v14  ;;  %v68_v25 = vsub.f32 %v381_v10, %v391_v14  ;;  %v72_v29 = vsub.f32 %v387_v12, %v391_v14 }
  0x12   :  { %v45_v20 = vmul.f32 1.442695, %v44_v15  ;;  %v49_v21 = vmul.f32 1.442695, %v48_v16  ;;  %v53_v22 = vmul.f32 1.442695, %v52_v17 }
  0x13   :  { %v57_v23 = vmul.f32 1.442695, %v56_v18  ;;  %v61_v26 = vmul.f32 1.442695, %v60_v19  ;;  %v65_v28 = vmul.f32 1.442695, %v64_v24  ;;  %v82_v18 = vsel %vm81_vm1, %v351_v1, %v80_v58 }
  0x14   :  { %272 = vpow2.f32 %v45_v20  ;;  %v69_v31 = vmul.f32 1.442695, %v68_v25  ;;  %v73_v34 = vmul.f32 1.442695, %v72_v29  ;;  %v131_v24 = vmin.f32 %v464_v61, %v478_v11 }
  0x15   :  { %274 = vpow2.f32 %v49_v21  ;;  %v129_v21 = vmax.f32 %v458_v59, %v470_v5  ;;  %v132_v1 = vmin.f32 %v467_v3, %v481_v13 }
  0x16   :  { %276 = vpow2.f32 %v53_v22 }
  0x17   :  { %278 = vpow2.f32 %v57_v23  ;;  %v130_v23 = vmax.f32 %v461_v60, %v475_v9 }
  0x18   :  { %280 = vpow2.f32 %v61_v26  ;;  %v84_v26 = vsel %vm83_vm2, %v356_v2, %v82_v18 }
  0x19   :  { %282 = vpow2.f32 %v65_v28 }
  0x1a   :  { %284 = vpow2.f32 %v69_v31  ;;  %v86_v31 = vsel %vm85_vm3, %v363_v4, %v84_v26  ;;  %v148_v26 = vmax.f32 %v467_v3, %v481_v13 }
  0x1b   :  { %286 = vrcp.f32 %v159_v32  ;;  %v133_v32 = vsub.f32 %v131_v24, %v129_v21  ;;  %v145_v24 = vmin.f32 %v458_v59, %v470_v5 }
  0x1c   :  { %288 = vrcp.f32 %v192_v33  ;;  %v135_v33 = vsub.f32 %v132_v1, %v130_v23  ;;  %v146_v1 = vmin.f32 %v461_v60, %v475_v9 }
  0x1d   :  { %290 = vpow2.f32 %v73_v34  ;;  %v88_v34 = vsel %vm87_vm4, %v369_v6, %v86_v31  ;;  %v134_v2 = vmax.f32 %v133_v32, 0.0 }
  0x21   :  { %v273_v35 = vpop.eup %272 }
  0x22   :  { %v275_v36 = vpop.eup %274 }
  0x23   :  { %v277_v37 = vpop.eup %276  ;;  %v51_v38 = vadd.f32 %v275_v36, %v273_v35  ;;  %v136_v35 = vmax.f32 %v135_v33, 0.0  ;;  %v138_v36 = vmul.f32 %v417_v30, %v257_v42 }
  0x24   :  { %v279_v39 = vpop.eup %278 }
  0x25   :  { %v55_v41 = vadd.f32 %v277_v37, %v51_v38  ;;  %v281_v43 = vpop.eup %280  ;;  %v139_v37 = vmul.f32 %v410_v27, %v260_v44  ;;  %v90_v38 = vsel %vm89_vm5, %v375_v8, %v88_v34  ;;  %v518_v4 = vmul.f32 %v136_v35, %v134_v2 }
  0x26   :  { %v283_v51 = vpop.eup %282  ;;  %v92_v6 = vsel %vm91_vm6, %v381_v10, %v90_v38  ;;  %v150_v2 = vsub.f32 %v148_v26, %v146_v1 }
  0x27   :  { %v59_v47 = vadd.f32 %v279_v39, %v55_v41  ;;  %v285_v54 = vpop.eup %284  ;;  %v140_v39 = vadd.f32 %v139_v37, %v138_v36  ;;  %v94_v40 = vsel %vm93_vm9, %v387_v12, %v92_v6 }
  0x28   :  { %v287_v57 = vpop.eup %286 }
  0x29   :  { %v63_v55 = vadd.f32 %v281_v43, %v59_v47  ;;  %v289_v62 = vpop.eup %288  ;;  %v472_v7 = vmul.f32 %v287_v57, %v260_v44  ;;  %v141_v43 = vsub.f32 %v140_v39, %v518_v4  ;;  %v157_v39 = vmul.f32 %v150_v2, %v150_v2 }
  0x2a   :  { %v291_v0 = vpop.eup %290  ;;  %v483_v15 = vmul.f32 %v289_v62, %v257_v42 }
  0x2b   :  { %v67_v63 = vadd.f32 %v283_v51, %v63_v55  ;;  %v486_v17 = vand.u32 2147483647, %v472_v7  ;;  %v142_v58 = vadd.f32 1e-08, %v141_v43  ;;  %vm162_vm1 = vcmp.lt.f32.partialorder %v472_v7, 0.0 }
  0x2c   :  { %v493_v19 = vand.u32 2147483647, %v483_v15  ;;  %vm195_vm2 = vcmp.lt.f32.partialorder %v483_v15, 0.0 }
  0x2d   :  { %v71_v16 = vadd.f32 %v285_v54, %v67_v63  ;;  %v171_v22 = vadd.f32 1e-30, %v486_v17  ;;  %v175_v25 = vadd.f32 1.0, %v486_v17  ;;  %vm165_vm7 = vcmp.gt.f32.partialorder %v486_v17, 2.4142137 }
  0x2e   :  { %v204_v28 = vadd.f32 1e-30, %v493_v19  ;;  %v208_v29 = vadd.f32 1.0, %v493_v19  ;;  %vm198_vm8 = vcmp.gt.f32.partialorder %v493_v19, 2.4142137  ;;  %vm167_vm12 = vmxor %vm165_vm7, %vm310_vm11  ;;  %v262_v8 = vadd.f32 -1.0, %v486_v17 }
  0x2f   :  { %v75_v20 = vadd.f32 %v291_v0, %v71_v16  ;;  %vm166_vm10 = vcmp.gt.f32.partialorder %v486_v17, 0.41421357  ;;  %vm199_vm13 = vcmp.gt.f32.partialorder %v493_v19, 0.41421357  ;;  %vm200_vm14 = vmxor %vm198_vm8, %vm310_vm11  ;;  %v265_v10 = vadd.f32 -1.0, %v493_v19 }
  0x30   :  { %vm533_vm15 = vmand %vm166_vm10, %vm167_vm12 }
  0x31   :  { %292 = vlog2.f32 %v75_v20  ;;  %vm538_vm0 = vmand %vm199_vm13, %vm200_vm14 }
  0x32   :  { %294 = vrcp.f32 %v171_v22 }
  0x33   :  { %296 = vrcp.f32 %v175_v25  ;;  %v147_v25 = vmax.f32 %v464_v61, %v478_v11 }
  0x34   :  { %298 = vrcp.f32 %v204_v28  ;;  %v311_v28 = vmov 0.0  }
  0x35   :  { %300 = vrcp.f32 %v208_v29  ;;  %v169_v29 = vsel %vm533_vm15, 0.7853982, %v311_v28  ;;  %v202_v34 = vsel %vm538_vm0, 0.7853982, %v311_v28  ;;  %v149_v5 = vsub.f32 %v147_v25, %v145_v24 }
  0x36   :  { %302 = vrcp.f32 %v142_v58  ;;  %v170_v60 = vsel %vm165_vm7, 1.5707964, %v169_v29  ;;  %v203_v3 = vsel %vm198_vm8, 1.5707964, %v202_v34 }
  0x37   :  { %v156_v38 = vmul.f32 %v149_v5, %v149_v5 }
  0x39   :  { %v158_v43 = vadd.f32 %v157_v39, %v156_v38 }
  0x3b   :  { %v233_v15 = vadd.f32 1e-08, %v158_v43 }
  0x3e   :  { %v293_v27 = vpop.eup %292 }
  0x3f   :  { %v295_v30 = vpop.eup %294  ;;  %v77_v41 = vmul.f32 0.6931472, %v293_v27  ;;  %v312_v27 = vmov 1.0  }
  0x40   :  { %v297_v42 = vpop.eup %296  ;;  %v173_v45 = vsub.f32 0.0, %v295_v30  ;;  %v163_v30 = vsel %vm162_vm1, -1.0, %v312_v27 }
  0x41   :  { %v299_v46 = vpop.eup %298  ;;  %v78_v47 = vadd.f32 %v77_v41, %v391_v14  ;;  %v177_v50 = vmul.f32 %v297_v42, %v262_v8 }
  0x42   :  { %v301_v51 = vpop.eup %300  ;;  %v206_v54 = vsub.f32 0.0, %v299_v46 }
  0x43   :  { %v542_v55 = vsub.f32 %v78_v47, %v94_v40  ;;  %v178_v12 = vsel %vm533_vm15, %v177_v50, %v486_v17  ;;  %v210_v57 = vmul.f32 %v301_v51, %v265_v10  ;;  %v303_v41 = vpop.eup %302  ;;  %v196_v40 = vsel %vm195_vm2, -1.0, %v312_v27 }
  0x44   :  { %v179_v62 = vsel %vm165_vm7, %v173_v45, %v178_v12  ;;  %v144_v47 = vmul.f32 %v303_v41, %v518_v4  ;;  %v151_v4 = vsub.f32 %v437_v48, %v447_v52 }
  0x45   :  { %v96_v14 = vsub.f32 0.0, %v542_v55  ;;  %v180_v63 = vmul.f32 %v179_v62, %v179_v62  ;;  %v211_v0 = vsel %vm538_vm0, %v210_v57, %v493_v19  ;;  %v187_v35 = vadd.f32 %v179_v62, %v170_v60 }
  0x46   :  { %v212_v16 = vsel %vm198_vm8, %v206_v54, %v211_v0  ;;  %v21_v54 = vld [vmem:[%s592_s4] sm:$0xff]  ;;  %v228_v58 = vsub.f32 1.0, %v144_v47  ;;  %v153_v0 = vsub.f32 %v442_v49, %v454_v56 }
  0x47   :  { %v97_v18 = vmul.f32 1.442695, %v96_v14  ;;  %v181_v20 = vmul.f32 0.080537446, %v180_v63  ;;  %v213_v21 = vmul.f32 %v212_v16, %v212_v16  ;;  %v188_v9 = vmul.f32 %v180_v63, %v179_v62 }
  0x48   :  { %v220_v17 = vadd.f32 %v212_v16, %v203_v3 }
  0x49   :  { %304 = vpow2.f32 %v97_v18  ;;  %v263_v22 = vadd.f32 -0.13877685, %v181_v20  ;;  %v214_v23 = vmul.f32 0.080537446, %v213_v21  ;;  %v221_v37 = vmul.f32 %v213_v21, %v212_v16 }
  0x4a   :  { %306 = vrcp.f32 %v233_v15  ;;  %v152_v18 = vmul.f32 %v151_v4, %v151_v4 }
  0x4b   :  { %v183_v31 = vmul.f32 %v263_v22, %v180_v63  ;;  %v266_v32 = vadd.f32 -0.13877685, %v214_v23 }
  0x4d   :  { %v184_v33 = vadd.f32 0.19977711, %v183_v31  ;;  %v216_v59 = vmul.f32 %v266_v32, %v213_v21 }
  0x4f   :  { %v185_v61 = vmul.f32 %v184_v33, %v180_v63  ;;  %v217_v11 = vadd.f32 0.19977711, %v216_v59 }
  0x51   :  { %v264_v13 = vadd.f32 -0.3333295, %v185_v61  ;;  %v218_v36 = vmul.f32 %v217_v11, %v213_v21 }
  0x53   :  { %v189_v6 = vmul.f32 %v264_v13, %v188_v9  ;;  %v267_v8 = vadd.f32 -0.3333295, %v218_v36 }
  0x55   :  { %v190_v10 = vadd.f32 %v189_v6, %v187_v35  ;;  %v222_v42 = vmul.f32 %v267_v8, %v221_v37 }
  0x56   :  { %v305_v7 = vpop.eup %304 }
  0x57   :  { %v99_v19 = vsub.f32 1.0, %v305_v7  ;;  %v191_v44 = vmul.f32 %v190_v10, %v163_v30  ;;  %v223_v45 = vadd.f32 %v222_v42, %v220_v17  ;;  %v307_v21 = vpop.eup %306 }
  0x59   :  { %v100_v46 = vmul.f32 %v99_v19, %v99_v19  ;;  %v224_v50 = vmul.f32 %v223_v45, %v196_v40 }
  0x5b   :  { %v101_v51 = vmul.f32 0.25, %v100_v46  ;;  %v225_v53 = vsub.f32 %v191_v44, %v224_v50 }
  0x5d   :  { %v102_v12 = vmul.f32 %v101_v51, %v542_v55  ;;  %v226_v57 = vmul.f32 0.40528473, %v225_v53  ;;  %v154_v55 = vmul.f32 %v153_v0, %v153_v0 }
  0x5f   :  { %v227_v62 = vmul.f32 %v226_v57, %v225_v53  ;;  %v240_v14 = vmul.f32 %v102_v12, %v21_v54  ;;  %v155_v20 = vadd.f32 %v154_v55, %v152_v18 }
  0x61   :  { %v229_v63 = vadd.f32 %v228_v58, %v227_v62  ;;  %241 = vst [vmem:[%s593_s5] sm:$0xff] %v240_v14  ;;  %v235_v22 = vmul.f32 %v307_v21, %v155_v20 }
  0x63   :  { %v230_v16 = vadd.f32 1e-08, %v229_v63  ;;  %v236_v1 = vsub.f32 %v144_v47, %v235_v22 }
  0x65   :  { %308 = vrcp.f32 %v230_v16 }
  0x72   :  { %v309_v23 = vpop.eup %308 }
  0x73   :  { %v232_v24 = vmul.f32 %v309_v23, %v227_v62 }
  0x75   :  { %v237_v25 = vmul.f32 %v232_v24, %v227_v62 }
  0x77   :  { %v238_v26 = vsub.f32 %v236_v1, %v237_v25 }
  0x79   :  { %v239_v28 = vsub.f32 1.0, %v238_v26 }
  0x7b   :  { %v242_v29 = vmul.f32 %v239_v28, %v21_v54 }
  0x7d   :  { %268 = vst [vmem:[%s593_s5 + $0x8] sm:$0xff] %v242_v29 }

// kernel: fast_detection_loss.3
= control target key start
LH: loop header
LB: loop body
LE: loop exit
PB: predicated region body
PF: predicated region fallthrough
CT: control target
= control target key end

     0   :  { %v340_v6 = vlaneseq  ;;  %s944_s0 = inlined_call_operand.vmem [shape: f32[128,128], index: 0, kind: input, shape index: {}]   ;;  %s945_s1 = inlined_call_operand.vmem [shape: f32[128,128], index: 1, kind: input, shape index: {}]   ;;  %s946_s2 = inlined_call_operand.vmem [shape: f32[1,128,128], index: 2, kind: output, shape index: {}]  }
   0x1   :  { %v76_v0 = vld [vmem:[%s944_s0] sm:$0xff]  ;;  %v640_v1 = vld [vmem:[%s944_s0 + $0x8] sm:$0xff]  ;;  %v646_v4 = vld [vmem:[%s944_s0 + $0x10] sm:$0xff] }
   0x2   :  { %v156_v2 = vand.u32 2147483647, %v76_v0  ;;  %v157_v3 = vand.u32 2147483647, %v640_v1  ;;  %v158_v9 = vand.u32 2147483647, %v646_v4 }
   0x3   :  { %v652_v11 = vld [vmem:[%s944_s0 + $0x18] sm:$0xff]  ;;  %v654_v13 = vshrl.u32 %v340_v6, 7  ;;  %v660_v16 = vld [vmem:[%s944_s0 + $0x20] sm:$0xff]  ;;  %v665_v18 = vld [vmem:[%s944_s0 + $0x28] sm:$0xff]  ;;  %v678_v26 = vand.u32 127, %v340_v6  ;;  %v108_v34 = vmax.f32 %v76_v0, 0.0 }
   0x4   :  { %v172_v5 = vsub.f32 0.0, %v156_v2  ;;  %v173_v7 = vsub.f32 0.0, %v157_v3  ;;  %v174_v12 = vsub.f32 0.0, %v158_v9  ;;  %v159_v15 = vand.u32 2147483647, %v652_v11  ;;  %v673_v24 = vld [vmem:[%s944_s0 + $0x30] sm:$0xff] }
   0x5   :  { %v342_v19 = vadd.s32 8, %v654_v13  ;;  %v160_v20 = vand.u32 2147483647, %v660_v16  ;;  %v161_v23 = vand.u32 2147483647, %v665_v18  ;;  %v92_v25 = vld [vmem:[%s945_s1] sm:$0xff] }
   0x6   :  { %v188_v8 = vmul.f32 1.442695, %v172_v5  ;;  %v190_v10 = vmul.f32 1.442695, %v173_v7  ;;  %v192_v14 = vmul.f32 1.442695, %v174_v12  ;;  %v124_v36 = vmul.f32 %v92_v25, %v76_v0 }
   0x7   :  { %v175_v17 = vsub.f32 0.0, %v159_v15  ;;  %v176_v22 = vsub.f32 0.0, %v160_v20  ;;  %v377_v27 = vmul.u32 128, %v654_v13  ;;  %v93_v28 = vld [vmem:[%s945_s1 + $0x8] sm:$0xff]  ;;  %v378_v29 = vmul.u32 128, %v342_v19  ;;  %v688_v33 = vld [vmem:[%s944_s0 + $0x38] sm:$0xff] }
   0x8   :  { %554 = vpow2.f32 %v188_v8  ;;  %v177_v31 = vsub.f32 0.0, %v161_v23  ;;  %v162_v32 = vand.u32 2147483647, %v673_v24  ;;  %v343_v35 = vadd.s32 16, %v654_v13  ;;  %v94_v39 = vld [vmem:[%s945_s1 + $0x10] sm:$0xff]  ;;  %v709_v57 = vld [vmem:[%s944_s0 + $0x40] sm:$0xff] }
   0x9   :  { %556 = vpow2.f32 %v190_v10  ;;  %v194_v21 = vmul.f32 1.442695, %v175_v17  ;;  %v196_v30 = vmul.f32 1.442695, %v176_v22  ;;  %v109_v37 = vmax.f32 %v640_v1, 0.0  ;;  %v95_v59 = vld [vmem:[%s945_s1 + $0x18] sm:$0xff] }
   0xa   :  { %558 = vpow2.f32 %v192_v14  ;;  %v125_v38 = vmul.f32 %v93_v28, %v640_v1  ;;  %v198_v40 = vmul.f32 1.442695, %v177_v31  ;;  %v393_v42 = vadd.s32 %v377_v27, %v678_v26  ;;  %v718_v61 = vld [vmem:[%s944_s0 + $0x48] sm:$0xff]  ;;  %v96_v8 = vld [vmem:[%s945_s1 + $0x20] sm:$0xff]  ;;  %v740_v17 = vld [vmem:[%s944_s0 + $0x50] sm:$0xff] }
   0xb   :  { %560 = vpow2.f32 %v194_v21  ;;  %v394_v43 = vadd.s32 %v378_v29, %v678_v26  ;;  %v178_v44 = vsub.f32 0.0, %v162_v32  ;;  %v163_v45 = vand.u32 2147483647, %v688_v33  ;;  %v97_v21 = vld [vmem:[%s945_s1 + $0x28] sm:$0xff] }
   0xc   :  { %562 = vpow2.f32 %v196_v30  ;;  %v110_v48 = vmax.f32 %v646_v4, 0.0  ;;  %v344_v49 = vadd.s32 24, %v654_v13  ;;  %v126_v51 = vmul.f32 %v94_v39, %v646_v4 }
   0xd   :  { %564 = vpow2.f32 %v198_v40  ;;  %v379_v52 = vmul.u32 128, %v343_v35  ;;  %v200_v53 = vmul.f32 1.442695, %v178_v44  ;;  %v702_v54 = vsub.f32 %v108_v34, %v124_v36 }
   0xe   :  { %v704_v55 = vsub.f32 %v109_v37, %v125_v38  ;;  %v179_v56 = vsub.f32 0.0, %v163_v45  ;;  %vm409_vm0 = vcmp.lt.s32.totalorder %v393_v42, 16000  ;;  %vm410_vm1 = vcmp.lt.s32.totalorder %v394_v43, 16000 }
   0xf   :  { %v345_v60 = vadd.s32 32, %v654_v13  ;;  %v380_v63 = vmul.u32 128, %v344_v49  ;;  %v720_v1 = vsub.f32 %v110_v48, %v126_v51  ;;  %v395_v2 = vadd.s32 %v379_v52, %v678_v26 }
  0x10   :  { %v202_v0 = vmul.f32 1.442695, %v179_v56  ;;  %v111_v3 = vmax.f32 %v652_v11, 0.0  ;;  %v164_v4 = vand.u32 2147483647, %v709_v57  ;;  %v618_v5 = vmov 0.0  }
  0x11   :  { %v726_v6 = vsel %vm409_vm0, 1.0, %v618_v5  ;;  %v127_v7 = vmul.f32 %v95_v59, %v652_v11  ;;  %v165_v9 = vand.u32 2147483647, %v718_v61  ;;  %v735_v12 = vsel %vm410_vm1, 1.0, %v618_v5  ;;  %v780_v56 = vld [vmem:[%s944_s0 + $0x60] sm:$0xff] }
  0x12   :  { %v381_v14 = vmul.u32 128, %v345_v60  ;;  %v180_v15 = vsub.f32 0.0, %v164_v4  ;;  %v396_v19 = vadd.s32 %v380_v63, %v678_v26  ;;  %v112_v20 = vmax.f32 %v660_v16, 0.0 }
  0x13   :  { %v181_v22 = vsub.f32 0.0, %v165_v9  ;;  %vm411_vm2 = vcmp.lt.s32.totalorder %v395_v2, 16000  ;;  %v128_v23 = vmul.f32 %v96_v8, %v660_v16  ;;  %v113_v25 = vmax.f32 %v665_v18, 0.0  ;;  %v756_v16 = vld [vmem:[%s944_s0 + $0x58] sm:$0xff] }
  0x14   :  { %v204_v27 = vmul.f32 1.442695, %v180_v15  ;;  %v346_v29 = vadd.s32 40, %v654_v13  ;;  %v166_v31 = vand.u32 2147483647, %v740_v17  ;;  %v397_v34 = vadd.s32 %v381_v14, %v678_v26 }
  0x15   :  { %v555_v41 = vpop.eup %554  ;;  %v206_v30 = vmul.f32 1.442695, %v181_v22  ;;  %v129_v35 = vmul.f32 %v97_v21, %v665_v18  ;;  %v758_v36 = vsub.f32 %v111_v3, %v127_v7  ;;  %vm412_vm3 = vcmp.lt.s32.totalorder %v396_v19, 16000  ;;  %v98_v18 = vld [vmem:[%s945_s1 + $0x30] sm:$0xff] }
  0x16   :  { %v557_v46 = vpop.eup %556  ;;  %v220_v47 = vadd.f32 1.0, %v555_v41  ;;  %v182_v37 = vsub.f32 0.0, %v166_v31  ;;  %v539_v39 = vsel %vm411_vm2, 1.0, %v618_v5  ;;  %v762_v40 = vsub.f32 %v112_v20, %v128_v23 }
  0x17   :  { %v221_v50 = vadd.f32 1.0, %v557_v46  ;;  %v559_v58 = vpop.eup %558  ;;  %v347_v41 = vadd.s32 48, %v654_v13  ;;  %v382_v43 = vmul.u32 128, %v346_v29  ;;  %v167_v45 = vand.u32 2147483647, %v756_v16 }
  0x18   :  { %566 = vlog2.f32 %v220_v47  ;;  %v222_v62 = vadd.f32 1.0, %v559_v58  ;;  %v561_v10 = vpop.eup %560  ;;  %v208_v44 = vmul.f32 1.442695, %v182_v37  ;;  %v770_v47 = vsel %vm412_vm3, 1.0, %v618_v5 }
  0x19   :  { %568 = vlog2.f32 %v221_v50  ;;  %v223_v11 = vadd.f32 1.0, %v561_v10  ;;  %v563_v28 = vpop.eup %562  ;;  %vm413_vm4 = vcmp.lt.s32.totalorder %v397_v34, 16000  ;;  %v772_v48 = vsub.f32 %v113_v25, %v129_v35  ;;  %v812_v34 = vld [vmem:[%s944_s0 + $0x68] sm:$0xff] }
  0x1a   :  { %570 = vpow2.f32 %v200_v53  ;;  %v224_v32 = vadd.f32 1.0, %v563_v28  ;;  %v565_v38 = vpop.eup %564  ;;  %v114_v49 = vmax.f32 %v673_v24, 0.0  ;;  %v130_v52 = vmul.f32 %v98_v18, %v673_v24 }
  0x1b   :  { %572 = vlog2.f32 %v222_v62  ;;  %v225_v42 = vadd.f32 1.0, %v565_v38  ;;  %v115_v53 = vmax.f32 %v688_v33, 0.0  ;;  %v383_v60 = vmul.u32 128, %v347_v41  ;;  %v99_v62 = vld [vmem:[%s945_s1 + $0x38] sm:$0xff]  ;;  %v100_v38 = vld [vmem:[%s945_s1 + $0x40] sm:$0xff] }
  0x1c   :  { %574 = vpow2.f32 %v202_v0  ;;  %v183_v63 = vsub.f32 0.0, %v167_v45  ;;  %v788_v24 = vsel %vm413_vm4, 1.0, %v618_v5  ;;  %v398_v2 = vadd.s32 %v382_v43, %v678_v26 }
  0x1d   :  { %576 = vlog2.f32 %v223_v11  ;;  %v348_v8 = vadd.s32 56, %v654_v13  ;;  %v168_v10 = vand.u32 2147483647, %v780_v56  ;;  %v399_v20 = vadd.s32 %v383_v60, %v678_v26 }
  0x1e   :  { %578 = vpow2.f32 %v204_v27  ;;  %v210_v9 = vmul.f32 1.442695, %v183_v63  ;;  %vm414_vm5 = vcmp.lt.s32.totalorder %v398_v2, 16000  ;;  %v349_v27 = vadd.s32 64, %v654_v13 }
  0x1f   :  { %580 = vpow2.f32 %v206_v30  ;;  %v184_v22 = vsub.f32 0.0, %v168_v10  ;;  %v384_v25 = vmul.u32 128, %v348_v8  ;;  %v146_v28 = vsub.f32 %v114_v49, %v130_v52  ;;  %v833_v52 = vld [vmem:[%s944_s0 + $0x70] sm:$0xff] }
  0x20   :  { %582 = vlog2.f32 %v224_v32  ;;  %vm415_vm6 = vcmp.lt.s32.totalorder %v399_v20, 16000 }
  0x21   :  { %584 = vlog2.f32 %v225_v42  ;;  %v212_v29 = vmul.f32 1.442695, %v184_v22  ;;  %v400_v41 = vadd.s32 %v384_v25, %v678_v26  ;;  %v385_v42 = vmul.u32 128, %v349_v27 }
  0x22   :  { %586 = vpow2.f32 %v208_v44  ;;  %v169_v44 = vand.u32 2147483647, %v812_v34  ;;  %v543_v49 = vsel %vm415_vm6, 1.0, %v618_v5  ;;  %v352_v25 = vadd.s32 88, %v654_v13 }
  0x23   :  { %vm416_vm7 = vcmp.lt.s32.totalorder %v400_v41, 16000 }
  0x25   :  { %v567_v46 = vpop.eup %566 }
  0x26   :  { %v569_v50 = vpop.eup %568  ;;  %v237_v51 = vmul.f32 0.6931472, %v567_v46 }
  0x27   :  { %v571_v58 = vpop.eup %570  ;;  %v239_v59 = vmul.f32 0.6931472, %v569_v50  ;;  %v116_v50 = vmax.f32 %v709_v57, 0.0 }
  0x28   :  { %v268_v0 = vadd.f32 %v237_v51, %v702_v54  ;;  %v226_v3 = vadd.f32 1.0, %v571_v58  ;;  %v573_v4 = vpop.eup %572  ;;  %v131_v54 = vmul.f32 %v99_v62, %v688_v33  ;;  %v132_v51 = vmul.f32 %v100_v38, %v709_v57  ;;  %v101_v58 = vld [vmem:[%s945_s1 + $0x48] sm:$0xff] }
  0x29   :  { %v269_v7 = vadd.f32 %v239_v59, %v704_v55  ;;  %v575_v14 = vpop.eup %574  ;;  %v241_v11 = vmul.f32 0.6931472, %v573_v4  ;;  %v185_v59 = vsub.f32 0.0, %v169_v44  ;;  %v401_v62 = vadd.s32 %v385_v42, %v678_v26 }
  0x2a   :  { %v473_v15 = vmul.f32 %v726_v6, %v268_v0  ;;  %588 = vlog2.f32 %v226_v3  ;;  %v227_v21 = vadd.f32 1.0, %v575_v14  ;;  %v577_v23 = vpop.eup %576  ;;  %v807_v31 = vsub.f32 %v115_v53, %v131_v54 }
  0x2b   :  { %v474_v19 = vmul.f32 %v735_v12, %v269_v7  ;;  %590 = vpow2.f32 %v210_v9  ;;  %v270_v55 = vadd.f32 %v241_v11, %v720_v1  ;;  %v579_v6 = vpop.eup %578  ;;  %v243_v12 = vmul.f32 0.6931472, %v577_v23 }
  0x2c   :  { %592 = vlog2.f32 %v227_v21  ;;  %505 = vst [vmem:[%s946_s2] sm:$0xff] %v473_v15  ;;  %v581_v30 = vpop.eup %580  ;;  %v542_v1 = vsel %vm414_vm5, 1.0, %v618_v5  ;;  %v228_v32 = vadd.f32 1.0, %v579_v6  ;;  %v214_v2 = vmul.f32 1.442695, %v185_v59  ;;  %v102_v21 = vld [vmem:[%s945_s1 + $0x50] sm:$0xff]  ;;  %v104_v59 = vld [vmem:[%s945_s1 + $0x60] sm:$0xff] }
  0x2d   :  { %v475_v33 = vmul.f32 %v539_v39, %v270_v55  ;;  %506 = vst [vmem:[%s946_s2 + $0x8] sm:$0xff] %v474_v19  ;;  %v583_v35 = vpop.eup %582  ;;  %v271_v37 = vadd.f32 %v243_v12, %v758_v36  ;;  %v229_v39 = vadd.f32 1.0, %v581_v30  ;;  %594 = vpow2.f32 %v212_v29 }
  0x2e   :  { %v245_v18 = vmul.f32 0.6931472, %v583_v35  ;;  %596 = vlog2.f32 %v228_v32  ;;  %v350_v36 = vadd.s32 72, %v654_v13  ;;  %v585_v45 = vpop.eup %584  ;;  %v170_v3 = vand.u32 2147483647, %v833_v52 }
  0x2f   :  { %507 = vst [vmem:[%s946_s2 + $0x10] sm:$0xff] %v475_v33  ;;  %v476_v43 = vmul.f32 %v770_v47, %v271_v37  ;;  %598 = vlog2.f32 %v229_v39  ;;  %v587_v47 = vpop.eup %586  ;;  %v247_v53 = vmul.f32 0.6931472, %v585_v45  ;;  %v133_v7 = vmul.f32 %v101_v58, %v718_v61 }
  0x30   :  { %v272_v46 = vadd.f32 %v245_v18, %v762_v40  ;;  %v117_v40 = vmax.f32 %v718_v61, 0.0  ;;  %v230_v57 = vadd.f32 1.0, %v587_v47  ;;  %v386_v0 = vmul.u32 128, %v350_v36  ;;  %v856_v61 = vld [vmem:[%s944_s0 + $0x78] sm:$0xff] }
  0x31   :  { %508 = vst [vmem:[%s946_s2 + $0x18] sm:$0xff] %v476_v43  ;;  %v273_v63 = vadd.f32 %v247_v53, %v772_v48  ;;  %v186_v14 = vsub.f32 0.0, %v170_v3  ;;  %v544_v48 = vsel %vm416_vm7, 1.0, %v618_v5  ;;  %v148_v15 = vsub.f32 %v116_v50, %v132_v51  ;;  %v103_v43 = vld [vmem:[%s945_s1 + $0x58] sm:$0xff] }
  0x32   :  { %v477_v60 = vmul.f32 %v788_v24, %v272_v46  ;;  %600 = vlog2.f32 %v230_v57  ;;  %v351_v24 = vadd.s32 80, %v654_v13  ;;  %vm417_vm8 = vcmp.lt.s32.totalorder %v401_v62, 16000 }
  0x33   :  { %v478_v9 = vmul.f32 %v542_v1, %v273_v63  ;;  %602 = vpow2.f32 %v214_v2  ;;  %v402_v20 = vadd.s32 %v386_v0, %v678_v26  ;;  %v216_v55 = vmul.f32 1.442695, %v186_v14 }
  0x34   :  { %509 = vst [vmem:[%s946_s2 + $0x20] sm:$0xff] %v477_v60  ;;  %v387_v23 = vmul.u32 128, %v351_v24  ;;  %v149_v6 = vsub.f32 %v117_v40, %v133_v7  ;;  %v171_v33 = vand.u32 2147483647, %v856_v61  ;;  %v545_v29 = vsel %vm417_vm8, 1.0, %v618_v5 }
  0x35   :  { %510 = vst [vmem:[%s946_s2 + $0x28] sm:$0xff] %v478_v9  ;;  %v118_v30 = vmax.f32 %v740_v17, 0.0  ;;  %v134_v1 = vmul.f32 %v102_v21, %v740_v17  ;;  %vm418_vm9 = vcmp.lt.s32.totalorder %v402_v20, 16000  ;;  %v388_v42 = vmul.u32 128, %v352_v25 }
  0x36   :  { %v187_v37 = vsub.f32 0.0, %v171_v33  ;;  %v403_v41 = vadd.s32 %v387_v23, %v678_v26  ;;  %v353_v17 = vadd.s32 96, %v654_v13  ;;  %v546_v45 = vsel %vm418_vm9, 1.0, %v618_v5 }
  0x37   :  { %v589_v4 = vpop.eup %588  ;;  %v119_v50 = vmax.f32 %v756_v16, 0.0  ;;  %v135_v47 = vmul.f32 %v103_v43, %v756_v16  ;;  %v404_v53 = vadd.s32 %v388_v42, %v678_v26  ;;  %v120_v0 = vmax.f32 %v780_v56, 0.0 }
  0x38   :  { %v591_v8 = vpop.eup %590  ;;  %v249_v10 = vmul.f32 0.6931472, %v589_v4  ;;  %v218_v36 = vmul.f32 1.442695, %v187_v37  ;;  %vm419_vm10 = vcmp.lt.s32.totalorder %v403_v41, 16000  ;;  %v389_v60 = vmul.u32 128, %v353_v17 }
  0x39   :  { %v231_v11 = vadd.f32 1.0, %v591_v8  ;;  %v593_v54 = vpop.eup %592  ;;  %v547_v63 = vsel %vm419_vm10, 1.0, %v618_v5  ;;  %v151_v3 = vsub.f32 %v119_v50, %v135_v47  ;;  %vm420_vm11 = vcmp.lt.s32.totalorder %v404_v53, 16000 }
  0x3a   :  { %v274_v19 = vadd.f32 %v249_v10, %v146_v28  ;;  %v251_v22 = vmul.f32 0.6931472, %v593_v54  ;;  %v595_v12 = vpop.eup %594  ;;  %v136_v4 = vmul.f32 %v104_v59, %v780_v56  ;;  %v405_v24 = vadd.s32 %v389_v60, %v678_v26  ;;  %v105_v56 = vld [vmem:[%s945_s1 + $0x68] sm:$0xff] }
  0x3b   :  { %604 = vlog2.f32 %v231_v11  ;;  %v597_v32 = vpop.eup %596  ;;  %v232_v35 = vadd.f32 1.0, %v595_v12  ;;  %v354_v8 = vadd.s32 104, %v654_v13  ;;  %v355_v20 = vadd.s32 112, %v654_v13 }
  0x3c   :  { %v479_v27 = vmul.f32 %v543_v49, %v274_v19  ;;  %606 = vpow2.f32 %v216_v55  ;;  %v275_v28 = vadd.f32 %v251_v22, %v807_v31  ;;  %v599_v38 = vpop.eup %598  ;;  %v253_v18 = vmul.f32 0.6931472, %v597_v32 }
  0x3d   :  { %v255_v31 = vmul.f32 0.6931472, %v599_v38  ;;  %608 = vlog2.f32 %v232_v35  ;;  %v150_v49 = vsub.f32 %v118_v30, %v134_v1  ;;  %v152_v54 = vsub.f32 %v120_v0, %v136_v4  ;;  %v106_v30 = vld [vmem:[%s945_s1 + $0x70] sm:$0xff] }
  0x3e   :  { %v480_v39 = vmul.f32 %v544_v48, %v275_v28  ;;  %511 = vst [vmem:[%s946_s2 + $0x30] sm:$0xff] %v479_v27  ;;  %v276_v44 = vadd.f32 %v253_v18, %v148_v15  ;;  %610 = vpow2.f32 %v218_v36  ;;  %v548_v48 = vsel %vm420_vm11, 1.0, %v618_v5 }
  0x3f   :  { %v277_v46 = vadd.f32 %v255_v31, %v149_v6  ;;  %v601_v58 = vpop.eup %600  ;;  %vm421_vm12 = vcmp.lt.s32.totalorder %v405_v24, 16000  ;;  %v390_v19 = vmul.u32 128, %v354_v8  ;;  %v121_v27 = vmax.f32 %v812_v34, 0.0 }
  0x40   :  { %512 = vst [vmem:[%s946_s2 + $0x38] sm:$0xff] %v480_v39  ;;  %v481_v51 = vmul.f32 %v545_v29, %v276_v44  ;;  %v603_v62 = vpop.eup %602  ;;  %v257_v57 = vmul.f32 0.6931472, %v601_v58  ;;  %v549_v25 = vsel %vm421_vm12, 1.0, %v618_v5  ;;  %v137_v6 = vmul.f32 %v105_v56, %v812_v34 }
  0x41   :  { %v482_v40 = vmul.f32 %v546_v45, %v277_v46  ;;  %v233_v2 = vadd.f32 1.0, %v603_v62  ;;  %v406_v12 = vadd.s32 %v390_v19, %v678_v26  ;;  %v391_v28 = vmul.u32 128, %v355_v20 }
  0x42   :  { %513 = vst [vmem:[%s946_s2 + $0x40] sm:$0xff] %v481_v51  ;;  %v278_v16 = vadd.f32 %v257_v57, %v150_v49  ;;  %v356_v32 = vadd.s32 120, %v654_v13  ;;  %v153_v35 = vsub.f32 %v121_v27, %v137_v6  ;;  %v122_v34 = vmax.f32 %v833_v52, 0.0  ;;  %v107_v13 = vld [vmem:[%s945_s1 + $0x78] sm:$0xff] }
  0x43   :  { %514 = vst [vmem:[%s946_s2 + $0x48] sm:$0xff] %v482_v40  ;;  %612 = vlog2.f32 %v233_v2  ;;  %vm422_vm13 = vcmp.lt.s32.totalorder %v406_v12, 16000  ;;  %v138_v37 = vmul.f32 %v106_v30, %v833_v52  ;;  %v407_v38 = vadd.s32 %v391_v28, %v678_v26 }
  0x44   :  { %v483_v10 = vmul.f32 %v547_v63, %v278_v16  ;;  %v392_v41 = vmul.u32 128, %v356_v32  ;;  %v550_v42 = vsel %vm422_vm13, 1.0, %v618_v5  ;;  %v123_v52 = vmax.f32 %v856_v61, 0.0 }
  0x45   :  { %v154_v43 = vsub.f32 %v122_v34, %v138_v37  ;;  %vm423_vm14 = vcmp.lt.s32.totalorder %v407_v38, 16000  ;;  %v139_v45 = vmul.f32 %v107_v13, %v856_v61 }
  0x46   :  { %515 = vst [vmem:[%s946_s2 + $0x50] sm:$0xff] %v483_v10  ;;  %v408_v46 = vadd.s32 %v392_v41, %v678_v26  ;;  %v551_v49 = vsel %vm423_vm14, 1.0, %v618_v5 }
  0x47   :  { %v155_v47 = vsub.f32 %v123_v52, %v139_v45 }
  0x48   :  { %v605_v7 = vpop.eup %604  ;;  %vm424_vm15 = vcmp.lt.s32.totalorder %v408_v46, 16000 }
  0x49   :  { %v607_v9 = vpop.eup %606  ;;  %v259_v14 = vmul.f32 0.6931472, %v605_v7  ;;  %v552_v40 = vsel %vm424_vm15, 1.0, %v618_v5 }
  0x4a   :  { %v234_v15 = vadd.f32 1.0, %v607_v9  ;;  %v609_v21 = vpop.eup %608 }
  0x4b   :  { %v279_v11 = vadd.f32 %v259_v14, %v151_v3  ;;  %v261_v22 = vmul.f32 0.6931472, %v609_v21  ;;  %v611_v23 = vpop.eup %610 }
  0x4c   :  { %614 = vlog2.f32 %v234_v15  ;;  %v235_v29 = vadd.f32 1.0, %v611_v23 }
  0x4d   :  { %v484_v55 = vmul.f32 %v548_v48, %v279_v11  ;;  %v280_v33 = vadd.f32 %v261_v22, %v152_v54 }
  0x4e   :  { %616 = vlog2.f32 %v235_v29 }
  0x4f   :  { %516 = vst [vmem:[%s946_s2 + $0x58] sm:$0xff] %v484_v55  ;;  %v485_v1 = vmul.f32 %v549_v25, %v280_v33 }
  0x50   :  { %v613_v39 = vpop.eup %612 }
  0x51   :  { %517 = vst [vmem:[%s946_s2 + $0x60] sm:$0xff] %v485_v1  ;;  %v263_v18 = vmul.f32 0.6931472, %v613_v39 }
  0x53   :  { %v281_v31 = vadd.f32 %v263_v18, %v153_v35 }
  0x55   :  { %v486_v36 = vmul.f32 %v550_v42, %v281_v31 }
  0x57   :  { %518 = vst [vmem:[%s946_s2 + $0x68] sm:$0xff] %v486_v36 }
  0x59   :  { %v615_v17 = vpop.eup %614 }
  0x5a   :  { %v265_v44 = vmul.f32 0.6931472, %v615_v17 }
  0x5b   :  { %v617_v53 = vpop.eup %616 }
  0x5c   :  { %v282_v50 = vadd.f32 %v265_v44, %v154_v43  ;;  %v267_v58 = vmul.f32 0.6931472, %v617_v53 }
  0x5e   :  { %v487_v51 = vmul.f32 %v551_v49, %v282_v50  ;;  %v283_v61 = vadd.f32 %v267_v58, %v155_v47 }
  0x60   :  { %519 = vst [vmem:[%s946_s2 + $0x70] sm:$0xff] %v487_v51  ;;  %v488_v26 = vmul.f32 %v552_v40, %v283_v61 }
  0x62   :  { %520 = vst [vmem:[%s946_s2 + $0x78] sm:$0xff] %v488_v26 }

// kernel: fast_detection_loss.4
= control target key start
LH: loop header
LB: loop body
LE: loop exit
PB: predicated region body
PF: predicated region fallthrough
CT: control target
= control target key end

     0   :  { %v102_v8 = vlaneseq  ;;  %v156_v31 = vmov 0.0   ;;  %s190_s0 = inlined_call_operand.vmem [shape: f32[16,128], index: 0, kind: input, shape index: {}]   ;;  %s191_s1 = inlined_call_operand.vmem [shape: f32[16,128], index: 1, kind: input, shape index: {}]   ;;  %s192_s2 = inlined_call_operand.vmem [shape: f32[1,16,128], index: 2, kind: output, shape index: {}]  }
   0x1   :  { %v62_v0 = vld [vmem:[%s190_s0] sm:$0xff]  ;;  %v63_v1 = vld [vmem:[%s190_s0 + $0x8] sm:$0xff] }
   0x2   :  { %v72_v2 = vand.u32 2147483647, %v62_v0  ;;  %v73_v3 = vand.u32 2147483647, %v63_v1  ;;  %v103_v10 = vshrl.u32 %v102_v8, 7  ;;  %v106_v15 = vand.u32 127, %v102_v8 }
   0x3   :  { %v64_v17 = vld [vmem:[%s191_s1] sm:$0xff]  ;;  %v65_v19 = vld [vmem:[%s191_s1 + $0x8] sm:$0xff]  ;;  %v66_v20 = vmax.f32 %v62_v0, 0.0  ;;  %v67_v23 = vmax.f32 %v63_v1, 0.0 }
   0x4   :  { %v74_v4 = vsub.f32 0.0, %v72_v2  ;;  %v75_v5 = vsub.f32 0.0, %v73_v3  ;;  %v104_v14 = vadd.s32 8, %v103_v10  ;;  %v111_v16 = vmul.u32 128, %v103_v10 }
   0x5   :  { %v68_v21 = vmul.f32 %v64_v17, %v62_v0  ;;  %v69_v24 = vmul.f32 %v65_v19, %v63_v1 }
   0x6   :  { %v76_v6 = vmul.f32 1.442695, %v74_v4  ;;  %v78_v7 = vmul.f32 1.442695, %v75_v5  ;;  %v112_v18 = vmul.u32 128, %v104_v14  ;;  %v113_v22 = vadd.s32 %v111_v16, %v106_v15 }
   0x7   :  { %v70_v26 = vsub.f32 %v66_v20, %v68_v21  ;;  %v71_v28 = vsub.f32 %v67_v23, %v69_v24 }
   0x8   :  { %148 = vpow2.f32 %v76_v6  ;;  %v114_v25 = vadd.s32 %v112_v18, %v106_v15  ;;  %vm115_vm0 = vcmp.lt.s32.totalorder %v113_v22, 2000 }
   0x9   :  { %150 = vpow2.f32 %v78_v7  ;;  %v145_v32 = vsel %vm115_vm0, 1.0, %v156_v31 }
   0xa   :  { %vm116_vm1 = vcmp.lt.s32.totalorder %v114_v25, 2000 }
   0xb   :  { %v146_v35 = vsel %vm116_vm1, 1.0, %v156_v31 }
  0x15   :  { %v149_v9 = vpop.eup %148 }
  0x16   :  { %v151_v11 = vpop.eup %150  ;;  %v80_v12 = vadd.f32 1.0, %v149_v9 }
  0x17   :  { %v81_v13 = vadd.f32 1.0, %v151_v11 }
  0x18   :  { %152 = vlog2.f32 %v80_v12 }
  0x19   :  { %154 = vlog2.f32 %v81_v13 }
  0x25   :  { %v153_v27 = vpop.eup %152 }
  0x26   :  { %v155_v29 = vpop.eup %154  ;;  %v83_v30 = vmul.f32 0.6931472, %v153_v27 }
  0x27   :  { %v85_v33 = vmul.f32 0.6931472, %v155_v29 }
  0x28   :  { %v86_v34 = vadd.f32 %v83_v30, %v70_v26 }
  0x29   :  { %v87_v36 = vadd.f32 %v85_v33, %v71_v28 }
  0x2a   :  { %v123_v37 = vmul.f32 %v145_v32, %v86_v34 }
  0x2b   :  { %v124_v38 = vmul.f32 %v146_v35, %v87_v36 }
  0x2c   :  { %127 = vst [vmem:[%s192_s2] sm:$0xff] %v123_v37 }
  0x2d   :  { %128 = vst [vmem:[%s192_s2 + $0x8] sm:$0xff] %v124_v38 }

</bundles_post_ra>
